<compile_context>
chip_gen: v5e
topology: v5e:2x2
jax: 0.10.0
libtpu: 0.0.40
codegen_flags: <defaults>
</compile_context>

<pallas_src>
import functools

import jax
import jax.numpy as jnp
from jax.experimental import pallas as pl
from jax.experimental.pallas import tpu as pltpu


def _round_up(x: int, m: int) -> int:
    return (x + m - 1) // m * m


def _pad2d(x, rows, cols):
    return jnp.pad(x, ((0, rows - x.shape[0]), (0, cols - x.shape[1])))


# ---------------------------------------------------------------------------
# Kernel: one (dst-tile i, src-tile k) grid step of the fused GINConv layer.
# ---------------------------------------------------------------------------
def _gin_kernel(a_ref, y1h_ref, y1l_ref, z1_ref, w2_ref, b2_ref, o_ref,
                acc_ref, *, tile_k: int, y1_resident: bool):
    # a_ref:   (TN, TK)         int8  adjacency tile, A[d, s] = 1 iff edge s->d
    # y1h/y1l: (TK | Nc, H)     bf16  hi/lo split of Y1 = feat @ W1_eff
    # z1_ref:  (TN, H)          f32   (1+eps)*Y1_dst + b1_eff  (BN folded in)
    # w2_ref:  (H, O)           f32   second GIN_MLP weight (resident)
    # b2_ref:  (1, O)           f32   second GIN_MLP bias (resident)
    # o_ref:   (TN, O)                output tile (written on the last K step)
    # acc_ref: (TN, H)          f32   VMEM accumulator for A @ Y1
    k = pl.program_id(1)

    @pl.when(k == 0)
    def _():
        acc_ref[...] = jnp.zeros_like(acc_ref)

    # {0,1} int8 -> bf16 upcast is lossless; keeps the dominant N^2 HBM stream
    # at 1 byte/elem while the matmul uses the fast bf16 MXU path.
    a = a_ref[...].astype(jnp.bfloat16)

    if y1_resident:
        off = pl.multiple_of(k * tile_k, tile_k)
        y1h = y1h_ref[pl.ds(off, tile_k), :]
        y1l = y1l_ref[pl.ds(off, tile_k), :]
    else:
        y1h = y1h_ref[...]
        y1l = y1l_ref[...]

    # bf16 hi/lo split: since A is exactly {0,1}, both products are exact and
    # the f32-accumulated sum recovers ~f32 accuracy at bf16 MXU throughput.
    acc_ref[...] += (jnp.dot(a, y1h, preferred_element_type=jnp.float32)
                     + jnp.dot(a, y1l, preferred_element_type=jnp.float32))

    @pl.when(k == pl.num_programs(1) - 1)
    def _():
        # h = ReLU( (1+eps)*feat_dst@W1 + (A@feat)@W1 + b1 )   (BN folded in)
        h = jnp.maximum(z1_ref[...] + acc_ref[...], 0.0)
        out = jnp.dot(h, w2_ref[...], preferred_element_type=jnp.float32)
        o_ref[...] = (out + b2_ref[...]).astype(o_ref.dtype)
    # TODO(synk): 'max'/'mean' aggregators, residual connections, learnable
    # eps, dropout masks and training-mode BatchNorm (needs global batch
    # statistics) are not wired up (module defaults: sum aggregation, eval-mode
    # BN, residual=False, learn_eps=False).


# ---------------------------------------------------------------------------
# Wrapper
# ---------------------------------------------------------------------------
def gin_conv(adj, feat, w1, b1, w2, b2, eps=0.0, *,
             bn_mean=None, bn_var=None, bn_gamma=None, bn_beta=None,
             bn_eps=1e-5, tile_n=512, tile_k=1024,
             y1_resident_budget=8 << 20):
    """Fused GINConv forward (sum aggregator, 2-layer GIN_MLP apply_func)."""
    N, D = feat.shape
    H = w1.shape[1]
    O = w2.shape[1]
    assert adj.shape == (N, N)
    assert w1.shape == (D, H) and w2.shape == (H, O)
    assert b1.shape == (H,) and b2.shape == (O,)
    assert tile_n % 128 == 0 and tile_k % 128 == 0

    # Fold eval-mode BatchNorm (between linear1 and ReLU) into (W1, b1).
    w1 = jnp.asarray(w1, jnp.float32)
    b1 = jnp.asarray(b1, jnp.float32)
    if bn_mean is not None:
        scale = bn_gamma / jnp.sqrt(bn_var + bn_eps)
        w1 = w1 * scale[None, :]
        b1 = (b1 - bn_mean) * scale + bn_beta

    H_pad = _round_up(H, 128)
    O_pad = _round_up(O, 128)

    # Clamp tiles to the (128-padded) node count; keep >= 2 destination tiles
    # when possible so the "parallel" axis load-balances across v7x's two TCs.
    n128 = _round_up(N, 128)
    tile_n = min(tile_n, n128)
    tile_k = min(tile_k, n128)
    if n128 // tile_n < 2 and n128 >= 256:
        tile_n = _round_up((n128 + 1) // 2, 128)

    # Rectangular padding (rows -> tile_n multiple, cols -> tile_k multiple):
    # waste bounded by one tile per axis, no lcm blow-up of the N^2 adjacency.
    N_rows = _round_up(N, tile_n)
    N_cols = _round_up(N, tile_k)

    # {0,1} adjacency stored as int8 in HBM (lossless, 1 byte/elem).
    adj_p = _pad2d(adj.astype(jnp.int8), N_rows, N_cols)

    # Reassociation: (A @ feat) @ W1 == A @ (feat @ W1).  feat @ W1_eff is a
    # tiny XLA matmul; only A @ Y1 sits in the kernel's K loop.
    # TODO(synk): when in_dim < hidden_dim, aggregating A@feat (width D) and
    # doing both MLP matmuls in the epilogue would stream fewer bytes; for the
    # default GIN config here D == H (padded) so it is a wash.
    feat = jnp.asarray(feat, jnp.float32)
    w1_p = _pad2d(w1, D, H_pad)
    b1_p = jnp.pad(b1, (0, H_pad - H))
    y1 = jnp.dot(feat, w1_p, precision=jax.lax.Precision.HIGHEST)  # (N, H_pad)

    # bf16 hi/lo split of Y1 (source-side operand of the big matmul).
    y1_hi = y1.astype(jnp.bfloat16)
    y1_lo = (y1 - y1_hi.astype(jnp.float32)).astype(jnp.bfloat16)
    y1_hi = _pad2d(y1_hi, N_cols, H_pad)
    y1_lo = _pad2d(y1_lo, N_cols, H_pad)

    # Destination-side self term with (1+eps) and bias folded (f32, streamed
    # once per destination tile).
    z1 = _pad2d((1.0 + eps) * y1 + b1_p[None, :], N_rows, H_pad)

    w2_p = _pad2d(jnp.asarray(w2, jnp.float32), H_pad, O_pad)
    b2_p = jnp.pad(jnp.asarray(b2, jnp.float32), (0, O_pad - O)).reshape(1, O_pad)

    # Keep Y1 hi/lo VMEM-resident (fetched once) when it fits the budget,
    # removing the per-destination-tile re-stream; otherwise stream K-blocks.
    y1_bytes = 2 * N_cols * H_pad * 2          # hi + lo, bf16
    y1_resident = y1_bytes <= y1_resident_budget
    if y1_resident:
        y1_spec = pl.BlockSpec((N_cols, H_pad), lambda i, k: (0, 0))
    else:
        y1_spec = pl.BlockSpec((tile_k, H_pad), lambda i, k: (k, 0))

    grid = (N_rows // tile_n, N_cols // tile_k)

    # Explicit scoped-VMEM budget (conservative, double-buffered estimate).
    y1_vmem = 2 * (y1_bytes if y1_resident else 2 * tile_k * H_pad * 2)
    est_vmem = (2 * tile_n * tile_k            # A tile (int8), double-buffered
                + y1_vmem                      # Y1 hi/lo
                + 2 * tile_n * H_pad * 4       # Z1
                + 2 * H_pad * O_pad * 4        # W2
                + 2 * O_pad * 4                # b2
                + 2 * tile_n * O_pad * 4       # out
                + tile_n * H_pad * 4)          # f32 accumulator scratch
    vmem_limit = int(min(max(est_vmem + (8 << 20), 32 << 20), 64 << 20))

    kernel = functools.partial(_gin_kernel, tile_k=tile_k,
                               y1_resident=y1_resident)

    out = pl.pallas_call(
        kernel,
        out_shape=jax.ShapeDtypeStruct((N_rows, O_pad), feat.dtype),
        grid_spec=pltpu.PrefetchScalarGridSpec(
            num_scalar_prefetch=0,
            grid=grid,
            in_specs=[
                pl.BlockSpec((tile_n, tile_k), lambda i, k: (i, k)),   # A tile
                y1_spec,                                               # Y1 hi
                y1_spec,                                               # Y1 lo
                pl.BlockSpec((tile_n, H_pad), lambda i, k: (i, 0)),    # Z1 dst
                pl.BlockSpec((H_pad, O_pad), lambda i, k: (0, 0)),     # W2
                pl.BlockSpec((1, O_pad), lambda i, k: (0, 0)),         # b2
            ],
            out_specs=pl.BlockSpec((tile_n, O_pad), lambda i, k: (i, 0)),
            scratch_shapes=[pltpu.VMEM((tile_n, H_pad), jnp.float32)],
        ),
        compiler_params=pltpu.CompilerParams(
            dimension_semantics=("parallel", "arbitrary"),
            vmem_limit_bytes=vmem_limit),
    )(adj_p, y1_hi, y1_lo, z1, w2_p, b2_p)

    return out[:N, :O]


# ---------------------------------------------------------------------------
# Pure-JAX reference (mirrors the PyTorch forward in eval mode)
# ---------------------------------------------------------------------------
def gin_conv_ref(adj, feat, w1, b1, w2, b2, eps,
                 bn_mean, bn_var, bn_gamma, bn_beta, bn_eps=1e-5):
    hp = jax.lax.Precision.HIGHEST
    neigh = jnp.dot(adj, feat, precision=hp)
    rst = (1.0 + eps) * feat + neigh
    lin1 = jnp.dot(rst, w1, precision=hp) + b1
    bn = (lin1 - bn_mean) * (bn_gamma / jnp.sqrt(bn_var + bn_eps)) + bn_beta
    h = jnp.maximum(bn, 0.0)
    return jnp.dot(h, w2, precision=hp) + b2


if __name__ == "__main__":
    key = jax.random.PRNGKey(0)
    k_adj, k_feat, kw1, kb1, kw2, kb2 = jax.random.split(key, 6)

    N = 512        # number of nodes
    IN_DIM = 32    # in_dim
    HIDDEN = 64    # num_hidden
    OUT_DIM = 48   # out_dim
    EPS = 0.0      # init_eps, learn_eps=False

    # Deterministic synthetic graph + parameters.
    adj = jax.random.bernoulli(k_adj, p=0.15, shape=(N, N)).astype(jnp.float32)
    feat = jax.random.normal(k_feat, (N, IN_DIM), dtype=jnp.float32)
    w1 = jax.random.normal(kw1, (IN_DIM, HIDDEN), jnp.float32) / jnp.sqrt(IN_DIM)
    b1 = jax.random.normal(kb1, (HIDDEN,), jnp.float32) * 0.01
    w2 = jax.random.normal(kw2, (HIDDEN, OUT_DIM), jnp.float32) / jnp.sqrt(HIDDEN)
    b2 = jax.random.normal(kb2, (OUT_DIM,), jnp.float32) * 0.01
    # Freshly-initialized BatchNorm1d running stats / affine (eval mode).
    bn_mean = jnp.zeros((HIDDEN,), jnp.float32)
    bn_var = jnp.ones((HIDDEN,), jnp.float32)
    bn_gamma = jnp.ones((HIDDEN,), jnp.float32)
    bn_beta = jnp.zeros((HIDDEN,), jnp.float32)

    ref = gin_conv_ref(adj, feat, w1, b1, w2, b2, EPS,
                       bn_mean, bn_var, bn_gamma, bn_beta)

    # 1) Default (large-tile) path: resident Y1, two destination tiles.
    out = gin_conv(adj, feat, w1, b1, w2, b2, EPS,
                   bn_mean=bn_mean, bn_var=bn_var,
                   bn_gamma=bn_gamma, bn_beta=bn_beta)
    out = jax.block_until_ready(out)
    assert out.shape == (N, OUT_DIM)
    assert jnp.allclose(out, ref, atol=1e-3, rtol=1e-3), \
        "mismatch vs reference (default tiles)"

    # 2) Small-tile / streamed-Y1 path: exercises the multi-step K reduction
    #    with the f32 accumulator and the blocked Y1 BlockSpec fallback.
    out2 = gin_conv(adj, feat, w1, b1, w2, b2, EPS,
                    bn_mean=bn_mean, bn_var=bn_var,
                    bn_gamma=bn_gamma, bn_beta=bn_beta,
                    tile_n=128, tile_k=128, y1_resident_budget=0)
    out2 = jax.block_until_ready(out2)
    assert jnp.allclose(out2, ref, atol=1e-3, rtol=1e-3), \
        "mismatch vs reference (small tiles, streamed Y1)"

    print("KERNEL_OK")
</pallas_src>

<mosaic_0001>
module attributes {stable_mosaic.version = 11 : i64} {
  func.func @_gin_kernel(%arg0: i32, %arg1: i32, %arg2: memref<256x512xi8, #tpu.memory_space<vmem>>, %arg3: memref<512x128xbf16, #tpu.memory_space<vmem>>, %arg4: memref<512x128xbf16, #tpu.memory_space<vmem>>, %arg5: memref<256x128xf32, #tpu.memory_space<vmem>>, %arg6: memref<128x128xf32, #tpu.memory_space<vmem>>, %arg7: memref<1x128xf32, #tpu.memory_space<vmem>>, %arg8: memref<256x128xf32, #tpu.memory_space<vmem>>, %arg9: memref<256x128xf32, #tpu.memory_space<vmem>>) attributes {dimension_semantics = [#tpu.dimension_semantics<parallel>, #tpu.dimension_semantics<arbitrary>], iteration_bounds = array<i64: 2, 1>, scalar_prefetch = 0 : i64, scratch_operands = 1 : i64, tpu.core_type = #tpu.core_type<tc>, window_params = [{transform_indices = @transform_0, window_bounds = array<i64: 256, 512>}, {pipeline_mode = #tpu.pipeline_mode<synchronous>, transform_indices = @transform_1, window_bounds = array<i64: 512, 128>}, {pipeline_mode = #tpu.pipeline_mode<synchronous>, transform_indices = @transform_2, window_bounds = array<i64: 512, 128>}, {transform_indices = @transform_3, window_bounds = array<i64: 256, 128>}, {pipeline_mode = #tpu.pipeline_mode<synchronous>, transform_indices = @transform_4, window_bounds = array<i64: 128, 128>}, {pipeline_mode = #tpu.pipeline_mode<synchronous>, transform_indices = @transform_5, window_bounds = array<i64: 1, 128>}, {transform_indices = @transform_6, window_bounds = array<i64: 256, 128>}]} {
    %c0_i32 = arith.constant 0 : i32
    %0 = arith.cmpi eq, %arg1, %c0_i32 : i32
    %1 = arith.extui %0 : i1 to i32
    %c0_i32_0 = arith.constant 0 : i32
    %2 = arith.cmpi ne, %1, %c0_i32_0 : i32
    scf.if %2 {
      %cst_11 = arith.constant 0.000000e+00 : f32
      %20 = vector.broadcast %cst_11 : f32 to vector<256x128xf32>
      %c0_12 = arith.constant 0 : index
      %c0_13 = arith.constant 0 : index
      %21 = vector.load %arg9[%c0_12, %c0_13] : memref<256x128xf32, #tpu.memory_space<vmem>>, vector<256x128xf32>
      tpu.vector_store %arg9[%c0_12, %c0_13], %20 {strides = array<i32>} : memref<256x128xf32, #tpu.memory_space<vmem>>, vector<256x128xf32>,
    } else {
    }
    %c0 = arith.constant 0 : index
    %c0_1 = arith.constant 0 : index
    %3 = vector.load %arg2[%c0, %c0_1] : memref<256x512xi8, #tpu.memory_space<vmem>>, vector<256x512xi8>
    %4 = arith.sitofp %3 : vector<256x512xi8> to vector<256x512xbf16>
    %c512_i32 = arith.constant 512 : i32
    %5 = arith.muli %arg1, %c512_i32 : i32
    %6 = tpu.assume_multiple %5, 512 : i32
    %7 = arith.index_cast %6 : i32 to index
    %c0_2 = arith.constant 0 : index
    %8 = vector.load %arg3[%7, %c0_2] : memref<512x128xbf16, #tpu.memory_space<vmem>>, vector<512x128xbf16>
    %9 = arith.index_cast %6 : i32 to index
    %c0_3 = arith.constant 0 : index
    %10 = vector.load %arg4[%9, %c0_3] : memref<512x128xbf16, #tpu.memory_space<vmem>>, vector<512x128xbf16>
    %c0_4 = arith.constant 0 : index
    %c0_5 = arith.constant 0 : index
    %11 = vector.load %arg9[%c0_4, %c0_5] : memref<256x128xf32, #tpu.memory_space<vmem>>, vector<256x128xf32>
    %cst = arith.constant dense<0.000000e+00> : vector<256x128xf32>
    %12 = tpu.matmul %4, %8, %cst {dimension_numbers = #tpu.dot_dimension_numbers<[1], [0], [0], [1], [0, 0, 1, 1], [], []>} : vector<256x512xbf16>, vector<512x128xbf16>, vector<256x128xf32> -> vector<256x128xf32>
    %cst_6 = arith.constant dense<0.000000e+00> : vector<256x128xf32>
    %13 = tpu.matmul %4, %10, %cst_6 {dimension_numbers = #tpu.dot_dimension_numbers<[1], [0], [0], [1], [0, 0, 1, 1], [], []>} : vector<256x512xbf16>, vector<512x128xbf16>, vector<256x128xf32> -> vector<256x128xf32>
    %14 = arith.addf %12, %13 : vector<256x128xf32>
    %15 = arith.addf %11, %14 : vector<256x128xf32>
    %c0_7 = arith.constant 0 : index
    %c0_8 = arith.constant 0 : index
    %16 = vector.load %arg9[%c0_7, %c0_8] : memref<256x128xf32, #tpu.memory_space<vmem>>, vector<256x128xf32>
    tpu.vector_store %arg9[%c0_7, %c0_8], %15 {strides = array<i32>} : memref<256x128xf32, #tpu.memory_space<vmem>>, vector<256x128xf32>,
    %c0_i32_9 = arith.constant 0 : i32
    %17 = arith.cmpi eq, %arg1, %c0_i32_9 : i32
    %18 = arith.extui %17 : i1 to i32
    %c0_i32_10 = arith.constant 0 : i32
    %19 = arith.cmpi ne, %18, %c0_i32_10 : i32
    scf.if %19 {
      %c0_11 = arith.constant 0 : index
      %c0_12 = arith.constant 0 : index
      %20 = vector.load %arg5[%c0_11, %c0_12] : memref<256x128xf32, #tpu.memory_space<vmem>>, vector<256x128xf32>
      %c0_13 = arith.constant 0 : index
      %c0_14 = arith.constant 0 : index
      %21 = vector.load %arg9[%c0_13, %c0_14] : memref<256x128xf32, #tpu.memory_space<vmem>>, vector<256x128xf32>
      %22 = arith.addf %20, %21 : vector<256x128xf32>
      %cst_15 = arith.constant 0.000000e+00 : f32
      %23 = vector.broadcast %cst_15 : f32 to vector<256x128xf32>
      %24 = arith.maximumf %22, %23 : vector<256x128xf32>
      %c0_16 = arith.constant 0 : index
      %c0_17 = arith.constant 0 : index
      %25 = vector.load %arg6[%c0_16, %c0_17] : memref<128x128xf32, #tpu.memory_space<vmem>>, vector<128x128xf32>
      %cst_18 = arith.constant dense<0.000000e+00> : vector<256x128xf32>
      %26 = tpu.matmul %24, %25, %cst_18 {dimension_numbers = #tpu.dot_dimension_numbers<[1], [0], [0], [1], [0, 0, 1, 1], [], []>} : vector<256x128xf32>, vector<128x128xf32>, vector<256x128xf32> -> vector<256x128xf32>
      %c0_19 = arith.constant 0 : index
      %c0_20 = arith.constant 0 : index
      %27 = vector.load %arg7[%c0_19, %c0_20] : memref<1x128xf32, #tpu.memory_space<vmem>>, vector<1x128xf32>
      %28 = vector.broadcast %27 : vector<1x128xf32> to vector<256x128xf32>
      %29 = arith.addf %26, %28 : vector<256x128xf32>
      %c0_21 = arith.constant 0 : index
      %c0_22 = arith.constant 0 : index
      %30 = vector.load %arg8[%c0_21, %c0_22] : memref<256x128xf32, #tpu.memory_space<vmem>>, vector<256x128xf32>
      tpu.vector_store %arg8[%c0_21, %c0_22], %29 {strides = array<i32>} : memref<256x128xf32, #tpu.memory_space<vmem>>, vector<256x128xf32>,
    } else {
    }
    return
  }
  func.func @transform_0(%arg0: i32, %arg1: i32) -> (i32, i32) {
    %c0_i32 = arith.constant 0 : i32
    return %arg0, %arg1 : i32, i32
  }
  func.func @transform_1(%arg0: i32, %arg1: i32) -> (i32, i32) {
    %c0_i32 = arith.constant 0 : i32
    %c0_i32_0 = arith.constant 0 : i32
    %c0_i32_1 = arith.constant 0 : i32
    return %c0_i32, %c0_i32_0 : i32, i32
  }
  func.func @transform_2(%arg0: i32, %arg1: i32) -> (i32, i32) {
    %c0_i32 = arith.constant 0 : i32
    %c0_i32_0 = arith.constant 0 : i32
    %c0_i32_1 = arith.constant 0 : i32
    return %c0_i32, %c0_i32_0 : i32, i32
  }
  func.func @transform_3(%arg0: i32, %arg1: i32) -> (i32, i32) {
    %c0_i32 = arith.constant 0 : i32
    %c0_i32_0 = arith.constant 0 : i32
    return %arg0, %c0_i32 : i32, i32
  }
  func.func @transform_4(%arg0: i32, %arg1: i32) -> (i32, i32) {
    %c0_i32 = arith.constant 0 : i32
    %c0_i32_0 = arith.constant 0 : i32
    %c0_i32_1 = arith.constant 0 : i32
    return %c0_i32, %c0_i32_0 : i32, i32
  }
  func.func @transform_5(%arg0: i32, %arg1: i32) -> (i32, i32) {
    %c0_i32 = arith.constant 0 : i32
    %c0_i32_0 = arith.constant 0 : i32
    %c0_i32_1 = arith.constant 0 : i32
    return %c0_i32, %c0_i32_0 : i32, i32
  }
  func.func @transform_6(%arg0: i32, %arg1: i32) -> (i32, i32) {
    %c0_i32 = arith.constant 0 : i32
    %c0_i32_0 = arith.constant 0 : i32
    return %arg0, %c0_i32 : i32, i32
  }
}

</mosaic_0001>

<bundles_post_ra>
// kernel: tpu_custom_call.1
= control target key start
LH: loop header
LB: loop body
LE: loop exit
PB: predicated region body
PF: predicated region fallthrough
CT: control target
= control target key end

     0   :  { %s4218_s0 = inlined_call_operand.hbm [shape: s8[512,512], index: 0, kind: input, shape index: {}]   ;;  %s4219_s1 = inlined_call_operand.hbm [shape: bf16[512,128], index: 1, kind: input, shape index: {}]   ;;  %s4220_s2 = inlined_call_operand.hbm [shape: bf16[512,128], index: 2, kind: input, shape index: {}]   ;;  %s4221_s3 = inlined_call_operand.hbm [shape: f32[512,128], index: 3, kind: input, shape index: {}]   ;;  %s4222_s4 = inlined_call_operand.hbm [shape: f32[128,128], index: 4, kind: input, shape index: {}]   ;;  %s4223_s5 = inlined_call_operand.vmem [shape: f32[1,128], index: 5, kind: input, shape index: {}]   ;;  %s4224_s6 = inlined_call_operand.hbm [shape: f32[512,128], index: 6, kind: output, shape index: {}]  }
   0x1   :  { %4255 = sst [smem:[#allocation60_spill]] %s4218_s0 }
   0x2   :  { %4256 = sst [smem:[#allocation61_spill]] %s4219_s1 }
   0x3   :  { %4257 = sst [smem:[#allocation62_spill]] %s4220_s2 }
   0x4   :  { %4258 = sst [smem:[#allocation63_spill]] %s4222_s4 }
   0x5   :  { %11 = vsyncpa [#allocation4], 0 }
   0x6   :  { %13 = vsyncpa [#allocation4 + $0x1], 0 }
   0x7   :  { %14 = vsyncpa [#allocation7], 0 }
   0x8   :  { %15 = vsyncpa [#allocation10], 0 }
   0x9   :  { %17 = vsyncpa [#allocation10 + $0x1], 0 }
   0xa   :  { %18 = vsyncpa [#allocation5], 0 }
   0xb   :  { %20 = vsyncpa [#allocation5 + $0x1], 0  ;;  %s3323_s21 = smov 0   ;;  %s3325_s22 = smov 0  }
   0xc   :  { %s3327_s23 = smov 0   ;;  %s3329_s24 = smov 0  }
   0xd   :  { %s3331_s25 = smov 0   ;;  %s3333_s26 = smov 0  }
   0xe LB: > { %4259 = sst [smem:[#allocation18_spill]] %s3263_s23  ;;  %s3354_s27 = sadd.s32 4294967295, %s3275_s26   ;;  %s3275_s26 = sphi %s3333_s26, %s26_s26   ;;  %s3271_s25 = sphi %s3331_s25, %s4370_s25   ;;  %s3267_s24 = sphi %s3329_s24, %s4369_s24   ;;  %s3263_s23 = sphi %s3327_s23, %s4373_s23   ;;  %s3259_s22 = sphi %s3325_s22, %s4372_s22   ;;  %s3255_s21 = sphi %s3323_s21, %s4371_s21  }
   0xf   : > { %4260 = sst [smem:[#allocation19_spill]] %s3271_s25  ;;  %s2551_s28 = sadd.s32 4294967294, %s3275_s26  }
  0x10   : > { %p60_p0 = scmp.ne.s32.totalorder %s3259_s22, %s3255_s21  ;;  %p61_p1 = scmp.eq.s32.totalorder %s3354_s27, 0 }
  0x11   : > { %p194_p2 = scmp.eq.s32.totalorder %s3354_s27, 1  ;;  %p200_p3 = scmp.eq.s32.totalorder %s2551_s28, 1 }
  0x12   : > { %p3363_p4 = por %p61_p1, %p60_p0  ;;  %p2552_p5 = scmp.ge.s32.totalorder %s3275_s26, 1 }
  0x13   : > { %p3368_p6 = por %p200_p3, %p60_p0  ;;  %p207_p7 = scmp.lt.s32.totalorder %s3275_s26, 3 }
  0x14   : > { %s4263_s1 = sld [smem:[#allocation61_spill]]  ;;  %s3277_s11 = smov [#allocation6]  }
  0x15   : > { %p3376_p8 = pnand %p2552_p5, %p207_p7  ;;  %s220_s12 = sshll.u32 %s3277_s11, 4  ;;  %s221_s12 = int_to_ptr.vmem [resolvable:$true] %s220_s12 }
  0x16   : > { %p2556_p11 = scmp.ge.s32.totalorder %s3275_s26, 2  ;;  %s4266_s4 = sld [smem:[#allocation63_spill]] }
  0x17   : > { %p2942_p9 = pneg %p3376_p8  ;;  %s3278_s17 = smov 64  }
  0x18   : > { %s3279_s18 = smov 4   ;;  %s3280_s19 = smov [#allocation11]  }
  0x19   : > { %p3384_p10 = pnand %p2942_p9, %p61_p1  ;;  %s248_s20 = sshll.u32 %s3280_s19, 4  ;;  %s249_s20 = int_to_ptr.vmem [resolvable:$true] %s248_s20 }
  0x1a   : > { %s218_s9 = sshll.u32 %s4263_s1, 4  ;;  %s4225_s28 = smov 128   ;;  %s219_s9 = int_to_ptr.hbm [resolvable:$true] %s218_s9 }
  0x1b   : > { %2945 = dma.hbm_to_vmem [thread:$0]  (!%p3384_p10), %s219_s9, 4096, %s221_s12, [#allocation7], %s3278_s17, %s3278_s17, %s3279_s18  }
  0x1c   : > { %s246_s16 = sshll.u32 %s4266_s4, 4  ;;  %s4226_s7 = smov 8   ;;  %s247_s16 = int_to_ptr.hbm [resolvable:$true] %s246_s16 }
  0x1d   : > { %2951 = dma.hbm_to_vmem [thread:$0]  (!%p3384_p10), %s247_s16, 2048, %s249_s20, [#allocation10], %s4225_s28, %s4225_s28, %s4226_s7  }
  0x1e   : > { %s4267_s2 = sld [smem:[#allocation62_spill]]  ;;  %s3283_s9 = smov [#allocation8]  }
  0x1f   : > { %s234_s12 = sshll.u32 %s3283_s9, 4  ;;  %s47_s15 = sadd.s32 1, %s3263_s23  ;;  %s235_s12 = int_to_ptr.vmem [resolvable:$true] %s234_s12 }
  0x20   : > { %s38_s19 = sadd.s32 1, %s3271_s25  ;;  %p54_p12 = scmp.ne.s32.totalorder %s3263_s23, %s3259_s22 }
  0x21   : > { %p40_p13 = scmp.ge.s32.totalorder %s38_s19, 2  ;;  %p55_p0 = scmp.eq.s32.totalorder %s3275_s26, 0 }
  0x22   : > { %p3411_p3 = por %p194_p2, %p54_p12  ;;  %p2966_p5 = scmp.lt.s32.totalorder %s3275_s26, 2 }
  0x23   : > { %s4375_s19 = smov (%p40_p13, %s38_s19), 0  ;;  %p3418_p7 = por %p55_p0, %p54_p12 }
  0x24   : > { %s232_s14 = sshll.u32 %s4267_s2, 4  ;;  %4269 = sst [smem:[#allocation20_spill]] %s4375_s19  ;;  %s233_s14 = int_to_ptr.hbm [resolvable:$true] %s232_s14 }
  0x25   : > { %2948 = dma.hbm_to_vmem [thread:$0]  (!%p3384_p10), %s233_s14, 4096, %s235_s12, [#allocation7], %s3278_s17, %s3278_s17, %s3279_s18  }
  0x26   : > { %s265_s13 = sand.u32 1, %s3263_s23   ;;  %s42_s17 = ssub.s32 %s3271_s25, %s4375_s19 }
  0x27   : > { %p45_p9 = scmp.eq.s32.totalorder %s42_s17, 0  ;;  %s2557_s18 = sshll.u32 %s265_s13, 8 }
  0x28   : > { %s2833_s8 = sshll.u32 %s3271_s25, 8  ;;  %s4272_s0 = sld [smem:[#allocation60_spill]] }
  0x29   : > { %s3427_s11 = scalar_select %p45_p9, %s3263_s23, %s47_s15  }
  0x2a   : > { %s269_s28 = scalar_lea.vmem [#allocation3], %s2557_s18  ;;  %p2953_p2 = pnand %p2966_p5, %p3418_p7 }
  0x2b   : > { %4271 = sst [smem:[#allocation21_spill]] %s3427_s11  ;;  %s280_s7 = sshll.u32 %s269_s28, 4  ;;  %s281_s7 = int_to_ptr.vmem [resolvable:$true] %s280_s7 }
  0x2c   : > { %s266_s2 = scalar_lea.sflag [#allocation4], %s265_s13  ;;  %s3284_s4 = smov 512  }
  0x2d   : > { %s3285_s17 = smov 32   ;;  %s299_s25 = scalar_lea.hbm %s4221_s3, %s2833_s8 }
  0x2e   : > { %s277_s12 = scalar_lea.hbm %s4272_s0, %s2833_s8  ;;  %s294_s11 = scalar_lea.vmem [#allocation9], %s2557_s18 }
  0x2f   : > { %s278_s1 = sshll.u32 %s277_s12, 4  ;;  %s302_s14 = sshll.u32 %s294_s11, 4  ;;  %s279_s1 = int_to_ptr.hbm [resolvable:$true] %s278_s1  ;;  %s303_s14 = int_to_ptr.vmem [resolvable:$true] %s302_s14 }
  0x30   : > { %2955 = dma.hbm_to_vmem [thread:$0]  (!%p2953_p2), %s279_s1, 4096, %s281_s7, %s266_s2, %s3284_s4, %s3284_s4, %s3285_s17  }
  0x31   : > { %s300_s9 = sshll.u32 %s299_s25, 4  ;;  %s290_s28 = sand.u32 1, %s3275_s26   ;;  %s301_s9 = int_to_ptr.hbm [resolvable:$true] %s300_s9 }
  0x32   : > { %s291_s12 = scalar_lea.sflag [#allocation10], %s290_s28  ;;  %s4273_s0 = smov 8  }
  0x33   : > { %s4274_s23 = smov 128   ;;  %314 = sbr.rel (%p3376_p8) target bundleno = 940 (0x3ac), region = 44 }
  0x34   : > { %2958 = dma.hbm_to_vmem [thread:$0]  (!%p2953_p2), %s301_s9, 4096, %s303_s14, %s291_s12, %s4274_s23, %s4274_s23, %s4273_s0  }
  0x38   : > { %s3446_s1 = sand.u32 1, %s3259_s22  }
  0x39   : > { %s3449_s2 = sshll.u32 %s3446_s1, 8  ;;  %s317_s4 = scalar_lea.sflag [#allocation4], %s3446_s1 }
  0x3a   : > { %s3453_s25 = scalar_lea.vmem [#allocation3], %s3449_s2 }
  0x3b   : > { %3234 = dma.done.wait (%p3363_p4), %s317_s4, 4096  }
  0x3c   : > { %3236 = vsyncadd (%p3363_p4), %s317_s4, 4294963200 }
  0x3d   : > { %3238 = dma.done.wait (%p61_p1), [#allocation7], 8192  }
  0x3e   : > { %3240 = vsyncadd (%p61_p1), [#allocation7], 4294959104  ;;  %s336_s0 = sand.u32 1, %s3354_s27   ;;  %s3465_s10 = scalar_lea.vmem [#allocation9], %s3449_s2 }
  0x3f   : > { %s337_s23 = scalar_lea.sflag [#allocation10], %s336_s0 }
  0x40   : > { %3242 = dma.done.wait (%p3363_p4), %s337_s23, 4096  }
  0x41   : > { %3244 = vsyncadd (%p3363_p4), %s337_s23, 4294963200 }
  0x42   : > { %3246 = dma.done.wait (%p61_p1), [#allocation10], 2048  }
  0x43   : > { %3248 = vsyncadd (%p61_p1), [#allocation10], 4294965248  ;;  %v2874_v0 = vld [vmem:[#allocation8 + $0x38] sm:$0xff]  ;;  %v2873_v1 = vld [vmem:[#allocation8 + $0x30] sm:$0xff]  ;;  %s4071_s7 = scalar_lea.vmem [#allocation12], %s3449_s2  ;;  %s2899_s19 = sshll.u32 %s3267_s24, 8 }
  0x44   : > { %2900 = vmatpush.bf16.msra.mxu1 %v2874_v0  ;;  %2901 = vmatpush.bf16.msra.mxu2 %v2874_v0  ;;  %v2872_v2 = vld [vmem:[#allocation8 + $0x28] sm:$0xff]  ;;  %v2871_v3 = vld [vmem:[#allocation8 + $0x20] sm:$0xff]  ;;  %v2870_v4 = vld [vmem:[#allocation8 + $0x18] sm:$0xff]  ;;  %s2407_s18 = scalar_lea.hbm %s4224_s6, %s2899_s19  ;;  %s2408_s8 = sshll.u32 %s4071_s7, 4  ;;  %s2409_s8 = int_to_ptr.vmem [resolvable:$true] %s2408_s8 }
  0x45   : > { %2902 = vmatpush.bf16.msra.mxu3 %v2874_v0  ;;  %1131 = vmatpush.bf16.msra.mxu0 %v2874_v0  ;;  %v3476_v5 = vld [vmem:[%s3453_s25 + $0x40] sm:$0xff]  ;;  %v2869_v6 = vld [vmem:[#allocation8 + $0x10] sm:$0xff]  ;;  %v2868_v13 = vld [vmem:[#allocation8 + $0x8] sm:$0xff]  ;;  %s2410_s11 = sshll.u32 %s2407_s18, 4  ;;  %s2396_s17 = scalar_lea.sflag [#allocation5], %s3446_s1  ;;  %s2411_s11 = int_to_ptr.hbm [resolvable:$true] %s2410_s11 }
  0x46   : > { %v3479_v7 = vld [vmem:[%s3453_s25 + $0x80] sm:$0xff]  ;;  %v484_v9 = vunpack.c.0.s8 %v3476_v5  ;;  %v488_v10 = vunpack.c.1.s8 %v3476_v5  ;;  %v2890_v26 = vld [vmem:[#allocation8 + $0xb8] sm:$0xff]  ;;  %v2889_v34 = vld [vmem:[#allocation8 + $0xb0] sm:$0xff]  ;;  %v492_v39 = vunpack.c.2.s8 %v3476_v5  ;;  %v496_v40 = vunpack.c.3.s8 %v3476_v5  ;;  %s3195_s15 = sshra.s32 %s2411_s11, 4  ;;  %s3201_s28 = scalar_lea.hbm %s4224_s6, 512  ;;  %s3196_s15 = int_to_ptr.hbm [resolvable:$true] %s3195_s15 }
  0x47   : > { %v3482_v8 = vld [vmem:[%s3453_s25 + $0xc0] sm:$0xff]  ;;  %v516_v11 = vunpack.c.0.s8 %v3479_v7  ;;  %v520_v12 = vunpack.c.1.s8 %v3479_v7  ;;  %v2898_v27 = vld [vmem:[#allocation8 + $0xf8] sm:$0xff]  ;;  %v2897_v35 = vld [vmem:[#allocation8 + $0xf0] sm:$0xff]  ;;  %v524_v43 = vunpack.c.2.s8 %v3479_v7  ;;  %v528_v44 = vunpack.c.3.s8 %v3479_v7  ;;  %s3197_s24 = scalar_lea.hbm %s3196_s15, 256  ;;  %p3202_p10 = scmp.lt.s32.totalorder %s3196_s15, %s4224_s6 }
  0x48   : > { %2903 = vmatpush.bf16.msra.mxu1 %v2873_v1  ;;  %2904 = vmatpush.bf16.msra.mxu2 %v2873_v1  ;;  %v548_v14 = vunpack.c.0.s8 %v3482_v8  ;;  %v552_v15 = vunpack.c.1.s8 %v3482_v8  ;;  %v3491_v16 = vld [vmem:[%s3453_s25] sm:$0xff]  ;;  %v612_v17 = vcvt.s32.f32 %v484_v9  ;;  %v616_v18 = vcvt.s32.f32 %v488_v10  ;;  %v2882_v28 = vld [vmem:[#allocation8 + $0x78] sm:$0xff]  ;;  %v2881_v36 = vld [vmem:[#allocation8 + $0x70] sm:$0xff]  ;;  %p3198_p1 = scmp.ne.s32.totalorder %s3196_s15, %s3197_s24  ;;  %p3203_p12 = scmp.lt.s32.totalorder %s3201_s28, %s3197_s24 }
  0x49   : > { %2905 = vmatpush.bf16.msra.mxu3 %v2873_v1  ;;  %1132 = vmatpush.bf16.msra.mxu0 %v2873_v1  ;;  %v644_v19 = vcvt.s32.f32 %v516_v11  ;;  %v648_v20 = vcvt.s32.f32 %v520_v12  ;;  %v452_v21 = vunpack.c.0.s8 %v3491_v16  ;;  %v456_v22 = vunpack.c.1.s8 %v3491_v16  ;;  %v2867_v23 = vld [vmem:[#allocation8] sm:$0xff]  ;;  %v2888_v38 = vld [vmem:[#allocation8 + $0xa8] sm:$0xff]  ;;  %v2842_v45 = vld [vmem:[#allocation6 + $0x38] sm:$0xff] }
  0x4a   : > { %v676_v24 = vcvt.s32.f32 %v548_v14  ;;  %v680_v25 = vcvt.s32.f32 %v552_v15  ;;  %v3495_v29 = vpack.c.bf16 %v616_v18, %v612_v17  ;;  %v2896_v41 = vld [vmem:[#allocation8 + $0xe8] sm:$0xff]  ;;  %v556_v46 = vunpack.c.2.s8 %v3482_v8  ;;  %v2887_v48 = vld [vmem:[#allocation8 + $0xa0] sm:$0xff]  ;;  %v2841_v49 = vld [vmem:[#allocation6 + $0x30] sm:$0xff]  ;;  %p3199_p4 = pnand %p3198_p1, %p3411_p3  ;;  %p3204_p13 = por %p3203_p12, %p3202_p10 }
  0x4b   : > { %v3497_v30 = vpack.c.bf16 %v648_v20, %v644_v19  ;;  %v580_v31 = vcvt.s32.f32 %v452_v21  ;;  %v584_v32 = vcvt.s32.f32 %v456_v22  ;;  %v2880_v42 = vld [vmem:[#allocation8 + $0x68] sm:$0xff]  ;;  %v560_v47 = vunpack.c.3.s8 %v3482_v8  ;;  %v2895_v52 = vld [vmem:[#allocation8 + $0xe0] sm:$0xff]  ;;  %v2886_v60 = vld [vmem:[#allocation8 + $0x98] sm:$0xff] }
  0x4c   : > { %2906 = vmatpush.bf16.msra.mxu1 %v2872_v2  ;;  %2907 = vmatpush.bf16.msra.mxu2 %v2872_v2  ;;  %v3499_v33 = vpack.c.bf16 %v680_v25, %v676_v24  ;;  %v620_v50 = vcvt.s32.f32 %v492_v39  ;;  %v624_v51 = vcvt.s32.f32 %v496_v40  ;;  %v2879_v53 = vld [vmem:[#allocation8 + $0x60] sm:$0xff]  ;;  %v652_v54 = vcvt.s32.f32 %v524_v43  ;;  %v2894_v61 = vld [vmem:[#allocation8 + $0xd8] sm:$0xff]  ;;  %v2893_v5 = vld [vmem:[#allocation8 + $0xd0] sm:$0xff]  ;;  %p3200_p8 = pneg %p3199_p4 }
  0x4d   : > { %2908 = vmatpush.bf16.msra.mxu3 %v2872_v2  ;;  %1133 = vmatpush.bf16.msra.mxu0 %v2872_v2  ;;  %v3503_v37 = vpack.c.bf16 %v584_v32, %v580_v31  ;;  %v656_v55 = vcvt.s32.f32 %v528_v44  ;;  %v460_v56 = vunpack.c.2.s8 %v3491_v16  ;;  %v464_v57 = vunpack.c.3.s8 %v3491_v16  ;;  %v2878_v62 = vld [vmem:[#allocation8 + $0x58] sm:$0xff]  ;;  %v3526_v8 = vld [vmem:[%s3453_s25 + $0x60] sm:$0xff]  ;;  %v2840_v10 = vld [vmem:[#allocation6 + $0x28] sm:$0xff] }
  0x4e   : > { %v684_v58 = vcvt.s32.f32 %v556_v46  ;;  %v688_v59 = vcvt.s32.f32 %v560_v47  ;;  %v3515_v63 = vpack.c.bf16 %v624_v51, %v620_v50  ;;  %v3530_v9 = vld [vmem:[%s3453_s25 + $0xa0] sm:$0xff]  ;;  %v2884_v12 = vld [vmem:[#allocation8 + $0x88] sm:$0xff]  ;;  %v504_v14 = vunpack.c.1.s8 %v3526_v8  ;;  %v2837_v44 = vld [vmem:[#allocation6 + $0x10] sm:$0xff]  ;;  %p3205_p0 = pnand %p3204_p13, %p3200_p8 }
  0x4f   : > { %v3517_v0 = vpack.c.bf16 %v656_v55, %v652_v54  ;;  %v588_v1 = vcvt.s32.f32 %v460_v56  ;;  %v592_v2 = vcvt.s32.f32 %v464_v57  ;;  %v3533_v11 = vld [vmem:[%s3453_s25 + $0xe0] sm:$0xff]  ;;  %v2892_v15 = vld [vmem:[#allocation8 + $0xc8] sm:$0xff]  ;;  %v532_v17 = vunpack.c.0.s8 %v3530_v9  ;;  %v2858_v46 = vld [vmem:[#allocation6 + $0xb8] sm:$0xff] }
  0x50   : > { %2909 = vmatpush.bf16.msra.mxu1 %v2871_v3  ;;  %2910 = vmatpush.bf16.msra.mxu2 %v2871_v3  ;;  %v2876_v16 = vld [vmem:[#allocation8 + $0x48] sm:$0xff]  ;;  %v536_v18 = vunpack.c.1.s8 %v3530_v9  ;;  %v564_v19 = vunpack.c.0.s8 %v3533_v11  ;;  %v568_v20 = vunpack.c.1.s8 %v3533_v11  ;;  %v424_v21 = vld [vmem:[%s3453_s25 + $0x20] sm:$0xff]  ;;  %v632_v25 = vcvt.s32.f32 %v504_v14  ;;  %v2866_v47 = vld [vmem:[#allocation6 + $0xf8] sm:$0xff] }
  0x51   : > { %2911 = vmatpush.bf16.msra.mxu3 %v2871_v3  ;;  %1134 = vmatpush.bf16.msra.mxu0 %v2871_v3  ;;  %v3519_v3 = vpack.c.bf16 %v688_v59, %v684_v58  ;;  %v3523_v7 = vpack.c.bf16 %v592_v2, %v588_v1  ;;  %v2839_v22 = vld [vmem:[#allocation6 + $0x20] sm:$0xff]  ;;  %v468_v32 = vunpack.c.0.s8 %v424_v21  ;;  %v508_v50 = vunpack.c.2.s8 %v3526_v8 }
  0x52   : > { %v664_v31 = vcvt.s32.f32 %v536_v18  ;;  %v512_v51 = vunpack.c.3.s8 %v3526_v8  ;;  %v572_v54 = vunpack.c.2.s8 %v3533_v11  ;;  %v576_v55 = vunpack.c.3.s8 %v3533_v11  ;;  %v2835_v56 = vld [vmem:[#allocation6] sm:$0xff]  ;;  %v421_v11 = vld [vmem:[%s3453_s25 + $0x8] sm:$0xff] }
  0x53   : > { %v636_v57 = vcvt.s32.f32 %v508_v50  ;;  %v453_v14 = vunpack.c.0.s8 %v421_v11 }
  0x54   : > { %2912 = vmatpush.bf16.msra.mxu1 %v2870_v4  ;;  %2913 = vmatpush.bf16.msra.mxu2 %v2870_v4  ;;  %v640_v58 = vcvt.s32.f32 %v512_v51  ;;  %v700_v1 = vcvt.s32.f32 %v572_v54  ;;  %v704_v2 = vcvt.s32.f32 %v576_v55  ;;  %v425_v54 = vld [vmem:[%s3453_s25 + $0x28] sm:$0xff]  ;;  %v426_v55 = vld [vmem:[%s3453_s25 + $0x30] sm:$0xff] }
  0x55   : > { %2914 = vmatpush.bf16.msra.mxu3 %v2870_v4  ;;  %1135 = vmatpush.bf16.msra.mxu0 %v2870_v4  ;;  %v2885_v4 = vld [vmem:[#allocation8 + $0x90] sm:$0xff] }
  0x58   : > { %2915 = vmatpush.bf16.msra.mxu1 %v2869_v6  ;;  %2916 = vmatpush.bf16.msra.mxu2 %v2869_v6 }
  0x59   : > { %2917 = vmatpush.bf16.msra.mxu3 %v2869_v6  ;;  %1136 = vmatpush.bf16.msra.mxu0 %v2869_v6  ;;  %v2877_v6 = vld [vmem:[#allocation8 + $0x50] sm:$0xff] }
  0x5c   : > { %2918 = vmatpush.bf16.msra.mxu1 %v2868_v13  ;;  %2919 = vmatpush.bf16.msra.mxu2 %v2868_v13 }
  0x5d   : > { %2920 = vmatpush.bf16.msra.mxu3 %v2868_v13  ;;  %1137 = vmatpush.bf16.msra.mxu0 %v2868_v13  ;;  %v500_v13 = vunpack.c.0.s8 %v3526_v8 }
  0x5f   : > { %v628_v24 = vcvt.s32.f32 %v500_v13  ;;  %v423_v13 = vld [vmem:[%s3453_s25 + $0x18] sm:$0xff] }
  0x60   : > { %2921 = vmatpush.bf16.msra.mxu1 %v2867_v23  ;;  %2922 = vmatpush.bf16.msra.mxu2 %v2867_v23  ;;  %v455_v18 = vunpack.c.0.s8 %v423_v13 }
  0x61   : > { %2923 = vmatpush.bf16.msra.mxu3 %v2867_v23  ;;  %1138 = vmatpush.bf16.msra.mxu0 %v2867_v23  ;;  %v2883_v23 = vld [vmem:[#allocation8 + $0x80] sm:$0xff]  ;;  %v3543_v39 = vpack.c.bf16 %v632_v25, %v628_v24 }
  0x62   : > { %v583_v24 = vcvt.s32.f32 %v455_v18  ;;  %v481_v18 = vunpack.c.3.s8 %v425_v54 }
  0x63   : > { %1159 = vmatmul.bf16.vlgmr.msra.gmra.mxu1 %v3495_v29  ;;  %1179 = vmatmul.bf16.vlgmr.msra.gmra.mxu2 %v3497_v30 }
  0x64   : > { %1309 = vmatpush.bf16.msrb.mxu2 %v2890_v26  ;;  %1220 = vmatpush.bf16.msrb.mxu1 %v2882_v28  ;;  %v2891_v26 = vld [vmem:[#allocation8 + $0xc0] sm:$0xff]  ;;  %v660_v28 = vcvt.s32.f32 %v532_v17 }
  0x65   : > { %1398 = vmatpush.bf16.msrb.mxu3 %v2898_v27  ;;  %1139 = vmatmul.bf16.vlgmr.msra.gmra.mxu0 %v3503_v37  ;;  %v2875_v27 = vld [vmem:[#allocation8 + $0x40] sm:$0xff] }
  0x66   : > { %1199 = vmatmul.bf16.vlgmr.msra.gmra.mxu3 %v3499_v33  ;;  %1679 = vmatpush.bf16.msrb.mxu0 %v2842_v45  ;;  %v3545_v40 = vpack.c.bf16 %v664_v31, %v660_v28  ;;  %v2857_v31 = vld [vmem:[#allocation6 + $0xb0] sm:$0xff] }
  0x68   : > { %1310 = vmatpush.bf16.msrb.mxu2 %v2889_v34  ;;  %1221 = vmatpush.bf16.msrb.mxu1 %v2881_v36  ;;  %v472_v34 = vunpack.c.1.s8 %v424_v21  ;;  %v696_v36 = vcvt.s32.f32 %v568_v20  ;;  %v581_v20 = vcvt.s32.f32 %v453_v14 }
  0x69   : > { %1399 = vmatpush.bf16.msrb.mxu3 %v2897_v35  ;;  %v692_v35 = vcvt.s32.f32 %v564_v19  ;;  %v459_v19 = vunpack.c.1.s8 %v423_v13 }
  0x6a   : > { %1680 = vmatpush.bf16.msrb.mxu0 %v2841_v49  ;;  %v2850_v49 = vld [vmem:[#allocation6 + $0x78] sm:$0xff] }
  0x6b   : > { %v3547_v43 = vpack.c.bf16 %v696_v36, %v692_v35  ;;  %v587_v25 = vcvt.s32.f32 %v459_v19  ;;  %v461_v35 = vunpack.c.2.s8 %v421_v11  ;;  %v465_v36 = vunpack.c.3.s8 %v421_v11 }
  0x6c   : > { %1311 = vmatpush.bf16.msrb.mxu2 %v2888_v38  ;;  %1222 = vmatpush.bf16.msrb.mxu1 %v2880_v42  ;;  %v2838_v38 = vld [vmem:[#allocation6 + $0x18] sm:$0xff]  ;;  %v600_v42 = vcvt.s32.f32 %v472_v34  ;;  %v2849_v34 = vld [vmem:[#allocation6 + $0x70] sm:$0xff]  ;;  %v478_v19 = vunpack.c.2.s8 %v426_v55 }
  0x6d   : > { %1400 = vmatpush.bf16.msrb.mxu3 %v2896_v41  ;;  %v596_v41 = vcvt.s32.f32 %v468_v32  ;;  %v3580_v28 = vpack.c.bf16 %v587_v25, %v583_v24  ;;  %v2865_v32 = vld [vmem:[#allocation6 + $0xf0] sm:$0xff]  ;;  %v609_v25 = vcvt.s32.f32 %v481_v18  ;;  %v2847_v18 = vld [vmem:[#allocation6 + $0x60] sm:$0xff] }
  0x6e   : > { %1681 = vmatpush.bf16.msrb.mxu0 %v2840_v10 }
  0x6f   : > { %v3551_v45 = vpack.c.bf16 %v600_v42, %v596_v41  ;;  %v463_v42 = vunpack.c.2.s8 %v423_v13 }
  0x70   : > { %1312 = vmatpush.bf16.msrb.mxu2 %v2887_v48  ;;  %1223 = vmatpush.bf16.msrb.mxu1 %v2879_v53  ;;  %v2836_v48 = vld [vmem:[#allocation6 + $0x8] sm:$0xff]  ;;  %v544_v53 = vunpack.c.3.s8 %v3530_v9 }
  0x71   : > { %1401 = vmatpush.bf16.msrb.mxu3 %v2895_v52  ;;  %v540_v52 = vunpack.c.2.s8 %v3530_v9  ;;  %v3565_v9 = vpack.c.bf16 %v704_v2, %v700_v1  ;;  %v591_v50 = vcvt.s32.f32 %v463_v42  ;;  %v430_v42 = vld [vmem:[%s3453_s25 + $0x50] sm:$0xff] }
  0x72   : > { %1682 = vmatpush.bf16.msrb.mxu0 %v2839_v22 }
  0x73   : > { %1164 = vmatmul.bf16.gmra.mxu1 %v3515_v63  ;;  %1184 = vmatmul.bf16.gmra.mxu2 %v3517_v0  ;;  %v668_v59 = vcvt.s32.f32 %v540_v52 }
  0x74   : > { %1313 = vmatpush.bf16.msrb.mxu2 %v2886_v60  ;;  %1224 = vmatpush.bf16.msrb.mxu1 %v2878_v62  ;;  %v672_v60 = vcvt.s32.f32 %v544_v53  ;;  %v480_v62 = vunpack.c.3.s8 %v424_v21 }
  0x75   : > { %1402 = vmatpush.bf16.msrb.mxu3 %v2894_v61  ;;  %1144 = vmatmul.bf16.gmra.mxu0 %v3523_v7  ;;  %v476_v61 = vunpack.c.2.s8 %v424_v21 }
  0x76   : > { %1204 = vmatmul.bf16.gmra.mxu3 %v3519_v3  ;;  %1683 = vmatpush.bf16.msrb.mxu0 %v2838_v38  ;;  %v608_v8 = vcvt.s32.f32 %v480_v62 }
  0x78   : > { %1314 = vmatpush.bf16.msrb.mxu2 %v2885_v4  ;;  %1225 = vmatpush.bf16.msrb.mxu1 %v2877_v6  ;;  %v3561_v4 = vpack.c.bf16 %v640_v58, %v636_v57  ;;  %v604_v6 = vcvt.s32.f32 %v476_v61  ;;  %v469_v57 = vunpack.c.0.s8 %v425_v54  ;;  %v473_v58 = vunpack.c.1.s8 %v425_v54 }
  0x79   : > { %1403 = vmatpush.bf16.msrb.mxu3 %v2893_v5  ;;  %v3563_v5 = vpack.c.bf16 %v672_v60, %v668_v59  ;;  %v470_v59 = vunpack.c.0.s8 %v426_v55  ;;  %v474_v60 = vunpack.c.1.s8 %v426_v55 }
  0x7a   : > { %1684 = vmatpush.bf16.msrb.mxu0 %v2837_v44  ;;  %v3569_v10 = vpack.c.bf16 %v608_v8, %v604_v6  ;;  %v467_v44 = vunpack.c.3.s8 %v423_v13  ;;  %v597_v1 = vcvt.s32.f32 %v469_v57  ;;  %v601_v2 = vcvt.s32.f32 %v473_v58 }
  0x7b   : > { %v598_v6 = vcvt.s32.f32 %v470_v59  ;;  %v602_v8 = vcvt.s32.f32 %v474_v60 }
  0x7c   : > { %1315 = vmatpush.bf16.msrb.mxu2 %v2884_v12  ;;  %1226 = vmatpush.bf16.msrb.mxu1 %v2876_v16  ;;  %v422_v12 = vld [vmem:[%s3453_s25 + $0x10] sm:$0xff]  ;;  %v595_v51 = vcvt.s32.f32 %v467_v44  ;;  %v3599_v13 = vpack.c.bf16 %v601_v2, %v597_v1  ;;  %v431_v44 = vld [vmem:[%s3453_s25 + $0x58] sm:$0xff]  ;;  %v2855_v2 = vld [vmem:[#allocation6 + $0xa0] sm:$0xff] }
  0x7d   : > { %1404 = vmatpush.bf16.msrb.mxu3 %v2892_v15  ;;  %v457_v15 = vunpack.c.1.s8 %v421_v11  ;;  %v454_v16 = vunpack.c.0.s8 %v422_v12  ;;  %v458_v17 = vunpack.c.1.s8 %v422_v12  ;;  %v462_v38 = vunpack.c.2.s8 %v422_v12 }
  0x7e   : > { %1685 = vmatpush.bf16.msrb.mxu0 %v2836_v48  ;;  %v466_v41 = vunpack.c.3.s8 %v422_v12  ;;  %v3601_v14 = vpack.c.bf16 %v602_v8, %v598_v6  ;;  %v2863_v6 = vld [vmem:[#allocation6 + $0xe0] sm:$0xff] }
  0x7f   : > { %v585_v21 = vcvt.s32.f32 %v457_v15  ;;  %v582_v22 = vcvt.s32.f32 %v454_v16  ;;  %v590_v48 = vcvt.s32.f32 %v462_v38  ;;  %v2864_v16 = vld [vmem:[#allocation6 + $0xe8] sm:$0xff] }
  0x80   : > { %1316 = vmatpush.bf16.msrb.mxu2 %v2883_v23  ;;  %1227 = vmatpush.bf16.msrb.mxu1 %v2875_v27  ;;  %v586_v23 = vcvt.s32.f32 %v458_v17  ;;  %v477_v17 = vunpack.c.2.s8 %v425_v54 }
  0x81   : > { %1405 = vmatpush.bf16.msrb.mxu3 %v2891_v26  ;;  %v3576_v26 = vpack.c.bf16 %v585_v21, %v581_v20  ;;  %v482_v20 = vunpack.c.3.s8 %v426_v55  ;;  %v2848_v21 = vld [vmem:[#allocation6 + $0x68] sm:$0xff] }
  0x82   : > { %1686 = vmatpush.bf16.msrb.mxu0 %v2835_v56  ;;  %v3578_v27 = vpack.c.bf16 %v586_v23, %v582_v22  ;;  %v427_v56 = vld [vmem:[%s3453_s25 + $0x38] sm:$0xff]  ;;  %v605_v24 = vcvt.s32.f32 %v477_v17  ;;  %v498_v17 = vunpack.c.3.s8 %v430_v42 }
  0x83   : > { %1169 = vmatmul.bf16.gmra.mxu1 %v3543_v39  ;;  %1189 = vmatmul.bf16.gmra.mxu2 %v3545_v40  ;;  %v471_v61 = vunpack.c.0.s8 %v427_v56  ;;  %v475_v62 = vunpack.c.1.s8 %v427_v56  ;;  %v479_v22 = vunpack.c.2.s8 %v427_v56  ;;  %v483_v23 = vunpack.c.3.s8 %v427_v56 }
  0x84   : > { %1857 = vmatpush.bf16.msra.mxu2 %v2858_v46  ;;  %1768 = vmatpush.bf16.msra.mxu1 %v2850_v49  ;;  %v589_v46 = vcvt.s32.f32 %v461_v35  ;;  %v594_v49 = vcvt.s32.f32 %v466_v41  ;;  %v429_v41 = vld [vmem:[%s3453_s25 + $0x48] sm:$0xff] }
  0x85   : > { %1946 = vmatpush.bf16.msra.mxu3 %v2866_v47  ;;  %1149 = vmatmul.bf16.gmra.mxu0 %v3551_v45  ;;  %v593_v47 = vcvt.s32.f32 %v465_v36  ;;  %v599_v11 = vcvt.s32.f32 %v471_v61  ;;  %v603_v12 = vcvt.s32.f32 %v475_v62  ;;  %v611_v35 = vcvt.s32.f32 %v483_v23 }
  0x86   : > { %1209 = vmatmul.bf16.gmra.mxu3 %v3547_v43  ;;  %v3588_v53 = vpack.c.bf16 %v594_v49, %v590_v48  ;;  %v3609_v36 = vpack.c.bf16 %v609_v25, %v605_v24  ;;  %v486_v48 = vunpack.c.0.s8 %v430_v42  ;;  %v490_v49 = vunpack.c.1.s8 %v430_v42 }
  0x87   : > { %v3586_v52 = vpack.c.bf16 %v593_v47, %v589_v46  ;;  %v3603_v15 = vpack.c.bf16 %v603_v12, %v599_v11  ;;  %v485_v46 = vunpack.c.0.s8 %v429_v41  ;;  %v489_v47 = vunpack.c.1.s8 %v429_v41 }
  0x88   : > { %1858 = vmatpush.bf16.msra.mxu2 %v2857_v31  ;;  %1769 = vmatpush.bf16.msra.mxu1 %v2849_v34  ;;  %v606_v31 = vcvt.s32.f32 %v478_v19  ;;  %v607_v34 = vcvt.s32.f32 %v479_v22  ;;  %v614_v56 = vcvt.s32.f32 %v486_v48  ;;  %v618_v57 = vcvt.s32.f32 %v490_v49  ;;  %v433_v48 = vld [vmem:[%s3453_s25 + $0x68] sm:$0xff]  ;;  %v434_v49 = vld [vmem:[%s3453_s25 + $0x70] sm:$0xff] }
  0x89   : > { %1947 = vmatpush.bf16.msra.mxu3 %v2865_v32  ;;  %v610_v32 = vcvt.s32.f32 %v482_v20  ;;  %v613_v54 = vcvt.s32.f32 %v485_v46  ;;  %v617_v55 = vcvt.s32.f32 %v489_v47  ;;  %v493_v12 = vunpack.c.2.s8 %v429_v41 }
  0x8a   : > { %v3613_v38 = vpack.c.bf16 %v611_v35, %v607_v34  ;;  %v3624_v61 = vpack.c.bf16 %v618_v57, %v614_v56  ;;  %v495_v20 = vunpack.c.2.s8 %v431_v44  ;;  %v626_v25 = vcvt.s32.f32 %v498_v17 }
  0x8b   : > { %v3622_v60 = vpack.c.bf16 %v617_v55, %v613_v54  ;;  %v621_v22 = vcvt.s32.f32 %v493_v12  ;;  %v501_v55 = vunpack.c.0.s8 %v433_v48  ;;  %v505_v56 = vunpack.c.1.s8 %v433_v48 }
  0x8c   : > { %1770 = vmatpush.bf16.msra.mxu1 %v2848_v21  ;;  %4276 = vst [vmem:[#allocation23_spill] sm:$0xff] %v3613_v38  ;;  %v499_v21 = vunpack.c.3.s8 %v431_v44  ;;  %v502_v57 = vunpack.c.0.s8 %v434_v49 }
  0x8d   : > { %1948 = vmatpush.bf16.msra.mxu3 %v2864_v16  ;;  %4277 = vst [vmem:[#allocation24_spill] sm:$0xff] %v3622_v60  ;;  %v494_v16 = vunpack.c.2.s8 %v430_v42  ;;  %v629_v12 = vcvt.s32.f32 %v501_v55  ;;  %v2854_v55 = vld [vmem:[#allocation6 + $0x98] sm:$0xff] }
  0x8e   : > { %4278 = vst [vmem:[#allocation25_spill] sm:$0xff] %v3624_v61 }
  0x8f   : > { %v622_v24 = vcvt.s32.f32 %v494_v16  ;;  %v630_v16 = vcvt.s32.f32 %v502_v57 }
  0x90   : > { %1771 = vmatpush.bf16.msra.mxu1 %v2847_v18 }
  0x91   : > { %1949 = vmatpush.bf16.msra.mxu3 %v2863_v6  ;;  %v3650_v42 = vpack.c.bf16 %v626_v25, %v622_v24 }
  0x93   : > { %1174 = vmatmul.bf16.gmra.mxu1 %v3561_v4  ;;  %1194 = vmatmul.bf16.gmra.mxu2 %v3563_v5  ;;  %4283 = vst [vmem:[#allocation30_spill] sm:$0xff] %v3650_v42 }
  0x95   : > { %1154 = vmatmul.bf16.gmra.mxu0 %v3569_v10 }
  0x96   : > { %1214 = vmatmul.bf16.gmra.mxu3 %v3565_v9 }
  0xa3   : > { %1228 = vmatmul.bf16.vlgmr.msrb.gmra.mxu1 %v3576_v26  ;;  %1317 = vmatmul.bf16.vlgmr.msrb.gmra.mxu2 %v3578_v27 }
  0xa5   : > { %1687 = vmatmul.bf16.vlgmr.msrb.gmra.mxu0 %v3503_v37  ;;  %v3590_v37 = vpack.c.bf16 %v595_v51, %v591_v50  ;;  %v487_v50 = vunpack.c.0.s8 %v431_v44  ;;  %v491_v51 = vunpack.c.1.s8 %v431_v44 }
  0xa6   : > { %1406 = vmatmul.bf16.vlgmr.msrb.gmra.mxu3 %v3580_v28 }
  0xa7   : > { %v615_v58 = vcvt.s32.f32 %v487_v50  ;;  %v619_v59 = vcvt.s32.f32 %v491_v51  ;;  %v435_v50 = vld [vmem:[%s3453_s25 + $0x78] sm:$0xff] }
  0xa8   : > { %v507_v6 = vunpack.c.1.s8 %v435_v50 }
  0xa9   : > { %v3628_v1 = vpack.c.bf16 %v619_v59, %v615_v58  ;;  %v506_v58 = vunpack.c.1.s8 %v434_v49 }
  0xab   : > { %4279 = vst [vmem:[#allocation26_spill] sm:$0xff] %v3628_v1  ;;  %v634_v17 = vcvt.s32.f32 %v506_v58 }
  0xad   : > { %v3679_v24 = vpack.c.bf16 %v634_v17, %v630_v16  ;;  %v511_v17 = vunpack.c.2.s8 %v435_v50 }
  0xaf   : > { %4288 = vst [vmem:[#allocation35_spill] sm:$0xff] %v3679_v24 }
  0xb3   : > { %1233 = vmatmul.bf16.gmra.mxu1 %v3586_v52  ;;  %1322 = vmatmul.bf16.gmra.mxu2 %v3588_v53 }
  0xb5   : > { %1692 = vmatmul.bf16.gmra.mxu0 %v3523_v7  ;;  %v2856_v7 = vld [vmem:[#allocation6 + $0xa8] sm:$0xff] }
  0xb6   : > { %1411 = vmatmul.bf16.gmra.mxu3 %v3590_v37  ;;  %1859 = vmatpush.bf16.msra.mxu2 %v2856_v7  ;;  %v497_v7 = vunpack.c.3.s8 %v429_v41 }
  0xb8   : > { %v625_v23 = vcvt.s32.f32 %v497_v7  ;;  %v633_v7 = vcvt.s32.f32 %v505_v56  ;;  %v2862_v56 = vld [vmem:[#allocation6 + $0xd8] sm:$0xff] }
  0xb9   : > { %1950 = vmatpush.bf16.msra.mxu3 %v2862_v56  ;;  %v639_v56 = vcvt.s32.f32 %v511_v17  ;;  %v437_v17 = vld [vmem:[%s3453_s25 + $0x88] sm:$0xff] }
  0xba   : > { %1860 = vmatpush.bf16.msra.mxu2 %v2855_v2  ;;  %v3648_v41 = vpack.c.bf16 %v625_v23, %v621_v22  ;;  %v503_v2 = vunpack.c.0.s8 %v435_v50 }
  0xbc   : > { %4282 = vst [vmem:[#allocation29_spill] sm:$0xff] %v3648_v41 }
  0xbe   : > { %1861 = vmatpush.bf16.msra.mxu2 %v2854_v55 }
  0xc3   : > { %1238 = vmatmul.bf16.gmra.mxu1 %v3599_v13  ;;  %1327 = vmatmul.bf16.gmra.mxu2 %v3601_v14 }
  0xc5   : > { %1697 = vmatmul.bf16.gmra.mxu0 %v3551_v45  ;;  %v3611_v45 = vpack.c.bf16 %v610_v32, %v606_v31  ;;  %v627_v32 = vcvt.s32.f32 %v499_v21  ;;  %v635_v21 = vcvt.s32.f32 %v507_v6  ;;  %v513_v6 = vunpack.c.3.s8 %v433_v48 }
  0xc6   : > { %1416 = vmatmul.bf16.gmra.mxu3 %v3603_v15 }
  0xc7   : > { %4275 = vst [vmem:[#allocation22_spill] sm:$0xff] %v3611_v45 }
  0xd3   : > { %1243 = vmatmul.bf16.gmra.mxu1 %v3609_v36  ;;  %1332 = vmatmul.bf16.gmra.mxu2 %v3611_v45 }
  0xd5   : > { %1702 = vmatmul.bf16.gmra.mxu0 %v3569_v10 }
  0xd6   : > { %1421 = vmatmul.bf16.gmra.mxu3 %v3613_v38 }
  0xe0   : > { %v3626_v62 = vpop.f32.mrf.mxu1 }
  0xe2   : > { %v3633_v10 = vpop.f32.mrf.mxu0 }
  0xe3   : > { %1248 = vmatmul.bf16.gmra.mxu1 %v3622_v60  ;;  %1337 = vmatmul.bf16.gmra.mxu2 %v3624_v61 }
  0xe5   : > { %1707 = vmatmul.bf16.gmra.mxu0 %v3495_v29  ;;  %v623_v29 = vcvt.s32.f32 %v495_v20  ;;  %v631_v20 = vcvt.s32.f32 %v503_v2  ;;  %v509_v2 = vunpack.c.2.s8 %v433_v48 }
  0xe6   : > { %1426 = vmatmul.bf16.gmra.mxu3 %v3628_v1  ;;  %v3635_v8 = vpop.f32.mrf.mxu2 }
  0xe7   : > { %v3654_v46 = vpack.c.bf16 %v627_v32, %v623_v29  ;;  %v3683_v29 = vpack.c.bf16 %v635_v21, %v631_v20  ;;  %v515_v20 = vunpack.c.3.s8 %v435_v50  ;;  %v2846_v21 = vld [vmem:[#allocation6 + $0x58] sm:$0xff] }
  0xe8   : > { %v3640_v19 = vpop.f32.mrf.mxu1  ;;  %1772 = vmatpush.bf16.msra.mxu1 %v2846_v21  ;;  %v521_v21 = vunpack.c.1.s8 %v437_v17 }
  0xe9   : > { %v3637_v11 = vpop.f32.mrf.mxu3  ;;  %4284 = vst [vmem:[#allocation31_spill] sm:$0xff] %v3654_v46 }
  0xea   : > { %4280 = vst [vmem:[#allocation27_spill] sm:$0xff] %v3637_v11  ;;  %v3642_v31 = vpop.f32.mrf.mxu0 }
  0xeb   : > { %4289 = vst [vmem:[#allocation36_spill] sm:$0xff] %v3683_v29 }
  0xee   : > { %v3644_v34 = vpop.f32.mrf.mxu2 }
  0xf0   : > { %v3652_v44 = vpop.f32.mrf.mxu1 }
  0xf1   : > { %v3646_v35 = vpop.f32.mrf.mxu3 }
  0xf2   : > { %4281 = vst [vmem:[#allocation28_spill] sm:$0xff] %v3646_v35  ;;  %v3659_v47 = vpop.f32.mrf.mxu0 }
  0xf3   : > { %1253 = vmatmul.bf16.gmra.mxu1 %v3648_v41  ;;  %1342 = vmatmul.bf16.gmra.mxu2 %v3650_v42 }
  0xf5   : > { %1712 = vmatmul.bf16.gmra.mxu0 %v3515_v63  ;;  %v3677_v63 = vpack.c.bf16 %v633_v7, %v629_v12  ;;  %v510_v12 = vunpack.c.2.s8 %v434_v49  ;;  %v514_v7 = vunpack.c.3.s8 %v434_v49 }
  0xf6   : > { %1431 = vmatmul.bf16.gmra.mxu3 %v3654_v46  ;;  %v3664_v51 = vpop.f32.mrf.mxu2 }
  0xf7   : > { %4287 = vst [vmem:[#allocation34_spill] sm:$0xff] %v3677_v63 }
  0xf8   : > { %v3669_v59 = vpop.f32.mrf.mxu1 }
  0xf9   : > { %v3666_v54 = vpop.f32.mrf.mxu3 }
  0xfa   : > { %4285 = vst [vmem:[#allocation32_spill] sm:$0xff] %v3666_v54  ;;  %v3671_v18 = vpop.f32.mrf.mxu0 }
  0xfe   : > { %v3673_v22 = vpop.f32.mrf.mxu2 }
 0x100   : > { %v3681_v25 = vpop.f32.mrf.mxu1 }
 0x101   : > { %v3675_v23 = vpop.f32.mrf.mxu3 }
 0x102   : > { %4286 = vst [vmem:[#allocation33_spill] sm:$0xff] %v3675_v23  ;;  %v3688_v32 = vpop.f32.mrf.mxu0  ;;  %v642_v23 = vcvt.s32.f32 %v514_v7 }
 0x103   : > { %1258 = vmatmul.bf16.gmra.mxu1 %v3677_v63  ;;  %1347 = vmatmul.bf16.gmra.mxu2 %v3679_v24  ;;  %v641_v24 = vcvt.s32.f32 %v513_v6  ;;  %v638_v63 = vcvt.s32.f32 %v510_v12  ;;  %v2245_v12 = vld [vmem:[#allocation11 + $0x78] sm:$0xff] }
 0x104   : > { %2250 = vmatpush.msra.mxu0 %v2245_v12 }
 0x105   : > { %1717 = vmatmul.bf16.gmra.mxu0 %v3543_v39  ;;  %v643_v39 = vcvt.s32.f32 %v515_v20  ;;  %v3705_v50 = vpack.c.bf16 %v642_v23, %v638_v63  ;;  %v438_v20 = vld [vmem:[%s3453_s25 + $0x90] sm:$0xff]  ;;  %v517_v63 = vunpack.c.0.s8 %v437_v17 }
 0x106   : > { %1436 = vmatmul.bf16.gmra.mxu3 %v3683_v29  ;;  %v3690_v57 = vpop.f32.mrf.mxu2  ;;  %v637_v29 = vcvt.s32.f32 %v509_v2 }
 0x107   : > { %4293 = vst [vmem:[#allocation40_spill] sm:$0xff] %v3705_v50  ;;  %v3709_v6 = vpack.c.bf16 %v643_v39, %v639_v56  ;;  %v518_v56 = vunpack.c.0.s8 %v438_v20  ;;  %v522_v39 = vunpack.c.1.s8 %v438_v20 }
 0x108   : > { %v3695_v16 = vpop.f32.mrf.mxu1 }
 0x109   : > { %v3692_v58 = vpop.f32.mrf.mxu3  ;;  %4294 = vst [vmem:[#allocation41_spill] sm:$0xff] %v3709_v6  ;;  %v646_v54 = vcvt.s32.f32 %v518_v56  ;;  %v650_v46 = vcvt.s32.f32 %v522_v39  ;;  %v2861_v56 = vld [vmem:[#allocation6 + $0xd0] sm:$0xff] }
 0x10a   : > { %4290 = vst [vmem:[#allocation37_spill] sm:$0xff] %v3692_v58  ;;  %v3697_v55 = vpop.f32.mrf.mxu0  ;;  %v3703_v58 = vpack.c.bf16 %v641_v24, %v637_v29  ;;  %v439_v24 = vld [vmem:[%s3453_s25 + $0x98] sm:$0xff]  ;;  %1951 = vmatpush.bf16.msra.mxu3 %v2861_v56 }
 0x10b   : > { %v3734_v1 = vpack.c.bf16 %v650_v46, %v646_v54  ;;  %v527_v39 = vunpack.c.2.s8 %v439_v24 }
 0x10c   : > { %4292 = vst [vmem:[#allocation39_spill] sm:$0xff] %v3703_v58 }
 0x10d   : > { %4300 = vst [vmem:[#allocation47_spill] sm:$0xff] %v3734_v1 }
 0x10e   : > { %v3699_v48 = vpop.f32.mrf.mxu2 }
 0x110   : > { %v3707_v2 = vpop.f32.mrf.mxu1 }
 0x111   : > { %v3701_v49 = vpop.f32.mrf.mxu3 }
 0x112   : > { %4291 = vst [vmem:[#allocation38_spill] sm:$0xff] %v3701_v49  ;;  %v3714_v7 = vpop.f32.mrf.mxu0  ;;  %v649_v49 = vcvt.s32.f32 %v521_v21  ;;  %v2244_v21 = vld [vmem:[#allocation11 + $0x70] sm:$0xff] }
 0x113   : > { %1263 = vmatmul.bf16.gmra.mxu1 %v3703_v58  ;;  %1352 = vmatmul.bf16.gmra.mxu2 %v3705_v50  ;;  %v519_v50 = vunpack.c.0.s8 %v439_v24  ;;  %v523_v58 = vunpack.c.1.s8 %v439_v24 }
 0x114   : > { %2251 = vmatpush.msra.mxu0 %v2244_v21  ;;  %v531_v21 = vunpack.c.3.s8 %v439_v24 }
 0x115   : > { %1722 = vmatmul.bf16.gmra.mxu0 %v3561_v4  ;;  %v647_v41 = vcvt.s32.f32 %v519_v50  ;;  %v651_v35 = vcvt.s32.f32 %v523_v58  ;;  %v2853_v50 = vld [vmem:[#allocation6 + $0x90] sm:$0xff] }
 0x116   : > { %1441 = vmatmul.bf16.gmra.mxu3 %v3709_v6  ;;  %v3719_v29 = vpop.f32.mrf.mxu2  ;;  %v645_v6 = vcvt.s32.f32 %v517_v63  ;;  %1862 = vmatpush.bf16.msra.mxu2 %v2853_v50 }
 0x117   : > { %4295 = vst [vmem:[#allocation42_spill] sm:$0xff] %v3719_v29  ;;  %v3736_v60 = vpack.c.bf16 %v651_v35, %v647_v41  ;;  %v530_v41 = vunpack.c.3.s8 %v438_v20 }
 0x118   : > { %v3724_v12 = vpop.f32.mrf.mxu1  ;;  %v3732_v4 = vpack.c.bf16 %v649_v49, %v645_v6  ;;  %v525_v6 = vunpack.c.2.s8 %v437_v17 }
 0x119   : > { %v3721_v23 = vpop.f32.mrf.mxu3  ;;  %4301 = vst [vmem:[#allocation48_spill] sm:$0xff] %v3736_v60  ;;  %v658_v56 = vcvt.s32.f32 %v530_v41 }
 0x11a   : > { %4296 = vst [vmem:[#allocation43_spill] sm:$0xff] %v3721_v23  ;;  %v3726_v42 = vpop.f32.mrf.mxu0 }
 0x11b   : > { %4299 = vst [vmem:[#allocation46_spill] sm:$0xff] %v3732_v4 }
 0x11e   : > { %v3728_v11 = vpop.f32.mrf.mxu2 }
 0x11f   : > { %4297 = vst [vmem:[#allocation44_spill] sm:$0xff] %v3728_v11 }
 0x120   : > { %v1229_v61 = vpop.f32.mrf.mxu1 }
 0x121   : > { %v3730_v23 = vpop.f32.mrf.mxu3  ;;  %v1230_v63 = vadd.f32 %v1229_v61, %v3633_v10  ;;  %v529_v61 = vunpack.c.3.s8 %v437_v17  ;;  %v526_v10 = vunpack.c.2.s8 %v438_v20 }
 0x122   : > { %4298 = vst [vmem:[#allocation45_spill] sm:$0xff] %v3730_v23  ;;  %v1688_v58 = vpop.f32.mrf.mxu0  ;;  %v653_v23 = vcvt.s32.f32 %v525_v6 }
 0x123   : > { %1268 = vmatmul.bf16.gmra.mxu1 %v3732_v4  ;;  %1357 = vmatmul.bf16.gmra.mxu2 %v3734_v1  ;;  %v2845_v4 = vld [vmem:[#allocation6 + $0x50] sm:$0xff]  ;;  %v657_v29 = vcvt.s32.f32 %v529_v61  ;;  %v654_v50 = vcvt.s32.f32 %v526_v10  ;;  %v3761_v61 = vld [vmem:[%s3453_s25 + $0xb8] sm:$0xff] }
 0x124   : > { %1773 = vmatpush.bf16.msra.mxu1 %v2845_v4  ;;  %v2243_v4 = vld [vmem:[#allocation11 + $0x68] sm:$0xff] }
 0x125   : > { %1727 = vmatmul.bf16.gmra.mxu0 %v3497_v30  ;;  %v659_v30 = vcvt.s32.f32 %v531_v21  ;;  %v3746_v24 = vpack.c.bf16 %v657_v29, %v653_v23  ;;  %v442_v23 = vld [vmem:[%s3453_s25 + $0xb0] sm:$0xff] }
 0x126   : > { %1446 = vmatmul.bf16.gmra.mxu3 %v3736_v60  ;;  %v1318_v49 = vpop.f32.mrf.mxu2  ;;  %2252 = vmatpush.msra.mxu0 %v2243_v4  ;;  %v538_v21 = vunpack.c.1.s8 %v442_v23 }
 0x127   : > { %v1319_v46 = vadd.f32 %v1318_v49, %v1230_v63  ;;  %v655_v49 = vcvt.s32.f32 %v527_v39  ;;  %4303 = vst [vmem:[#allocation50_spill] sm:$0xff] %v3746_v24  ;;  %v534_v39 = vunpack.c.0.s8 %v442_v23 }
 0x128   : > { %v1231_v54 = vpop.f32.mrf.mxu1 }
 0x129   : > { %v1407_v35 = vpop.f32.mrf.mxu3  ;;  %v1232_v60 = vadd.f32 %v1231_v54, %v3642_v31  ;;  %v3748_v31 = vpack.c.bf16 %v658_v56, %v654_v50  ;;  %v535_v56 = vunpack.c.0.s8 %v3761_v61 }
 0x12a   : > { %v1408_v1 = vadd.f32 %v1407_v35, %v1319_v46  ;;  %v1690_v63 = vpop.f32.mrf.mxu0 }
 0x12b   : > { %4304 = vst [vmem:[#allocation51_spill] sm:$0xff] %v3748_v31 }
 0x12c   : > { %v3744_v11 = vadd.f32 %v1688_v58, %v1408_v1  ;;  %v3750_v1 = vpack.c.bf16 %v659_v30, %v655_v49 }
 0x12e   : > { %4302 = vst [vmem:[#allocation49_spill] sm:$0xff] %v3744_v11  ;;  %v1320_v17 = vpop.f32.mrf.mxu2 }
 0x12f   : > { %v1321_v20 = vadd.f32 %v1320_v17, %v1232_v60  ;;  %4305 = vst [vmem:[#allocation52_spill] sm:$0xff] %v3750_v1  ;;  %v441_v60 = vld [vmem:[%s3453_s25 + $0xa8] sm:$0xff] }
 0x130   : > { %v1234_v6 = vpop.f32.mrf.mxu1  ;;  %v533_v41 = vunpack.c.0.s8 %v441_v60 }
 0x131   : > { %v1409_v38 = vpop.f32.mrf.mxu3  ;;  %v1235_v46 = vadd.f32 %v1234_v6, %v3659_v47  ;;  %v537_v47 = vunpack.c.1.s8 %v441_v60 }
 0x132   : > { %v1410_v58 = vadd.f32 %v1409_v38, %v1321_v20  ;;  %v1693_v29 = vpop.f32.mrf.mxu0  ;;  %v661_v17 = vcvt.s32.f32 %v533_v41  ;;  %v2242_v41 = vld [vmem:[#allocation11 + $0x60] sm:$0xff] }
 0x133   : > { %1273 = vmatmul.bf16.gmra.mxu1 %v3746_v24  ;;  %1362 = vmatmul.bf16.gmra.mxu2 %v3748_v31  ;;  %v665_v6 = vcvt.s32.f32 %v537_v47  ;;  %v2852_v47 = vld [vmem:[#allocation6 + $0x88] sm:$0xff] }
 0x134   : > { %v3753_v35 = vadd.f32 %v1690_v63, %v1410_v58  ;;  %v539_v63 = vunpack.c.1.s8 %v3761_v61  ;;  %v662_v58 = vcvt.s32.f32 %v534_v39  ;;  %2253 = vmatpush.msra.mxu0 %v2242_v41  ;;  %v2860_v39 = vld [vmem:[#allocation6 + $0xc8] sm:$0xff]  ;;  %1863 = vmatpush.bf16.msra.mxu2 %v2852_v47 }
 0x135   : > { %1732 = vmatmul.bf16.gmra.mxu0 %v3517_v0  ;;  %1952 = vmatpush.bf16.msra.mxu3 %v2860_v39 }
 0x136   : > { %4306 = vst [vmem:[#allocation53_spill] sm:$0xff] %v3753_v35  ;;  %1451 = vmatmul.bf16.gmra.mxu3 %v3750_v1  ;;  %v1323_v10 = vpop.f32.mrf.mxu2  ;;  %v667_v0 = vcvt.s32.f32 %v539_v63  ;;  %v3769_v35 = vpack.c.bf16 %v665_v6, %v661_v17 }
 0x137   : > { %v1324_v38 = vadd.f32 %v1323_v10, %v1235_v46  ;;  %v666_v46 = vcvt.s32.f32 %v538_v21  ;;  %v663_v10 = vcvt.s32.f32 %v535_v56  ;;  %v546_v56 = vunpack.c.3.s8 %v442_v23 }
 0x138   : > { %v1236_v50 = vpop.f32.mrf.mxu1 }
 0x139   : > { %v1412_v54 = vpop.f32.mrf.mxu3  ;;  %v1237_v30 = vadd.f32 %v1236_v50, %v3671_v18  ;;  %v3771_v11 = vpack.c.bf16 %v666_v46, %v662_v58  ;;  %v541_v50 = vunpack.c.2.s8 %v441_v60  ;;  %v2844_v58 = vld [vmem:[#allocation6 + $0x48] sm:$0xff] }
 0x13a   : > { %v1413_v49 = vadd.f32 %v1412_v54, %v1324_v38  ;;  %v1695_v4 = vpop.f32.mrf.mxu0  ;;  %v3773_v38 = vpack.c.bf16 %v667_v0, %v663_v10  ;;  %1774 = vmatpush.bf16.msra.mxu1 %v2844_v58 }
 0x13b   : > { %v669_v46 = vcvt.s32.f32 %v541_v50 }
 0x13c   : > { %v3767_v20 = vadd.f32 %v1693_v29, %v1413_v49  ;;  %v543_v49 = vunpack.c.2.s8 %v3761_v61 }
 0x13e   : > { %v1325_v1 = vpop.f32.mrf.mxu2 }
 0x13f   : > { %v1326_v31 = vadd.f32 %v1325_v1, %v1237_v30  ;;  %v547_v30 = vunpack.c.3.s8 %v3761_v61 }
 0x140   : > { %v1239_v45 = vpop.f32.mrf.mxu1 }
 0x141   : > { %v1414_v24 = vpop.f32.mrf.mxu3  ;;  %v1240_v29 = vadd.f32 %v1239_v45, %v3688_v32  ;;  %v545_v45 = vunpack.c.3.s8 %v441_v60  ;;  %v542_v32 = vunpack.c.2.s8 %v442_v23  ;;  %v671_v60 = vcvt.s32.f32 %v543_v49 }
 0x142   : > { %v1415_v18 = vadd.f32 %v1414_v24, %v1326_v31  ;;  %v1698_v1 = vpop.f32.mrf.mxu0  ;;  %v675_v23 = vcvt.s32.f32 %v547_v30 }
 0x143   : > { %1278 = vmatmul.bf16.gmra.mxu1 %v3769_v35  ;;  %1367 = vmatmul.bf16.gmra.mxu2 %v3771_v11  ;;  %v673_v10 = vcvt.s32.f32 %v545_v45  ;;  %v670_v0 = vcvt.s32.f32 %v542_v32  ;;  %v445_v45 = vld [vmem:[%s3453_s25 + $0xc8] sm:$0xff]  ;;  %v446_v32 = vld [vmem:[%s3453_s25 + $0xd0] sm:$0xff] }
 0x144   : > { %v3776_v54 = vadd.f32 %v1695_v4, %v1415_v18  ;;  %v674_v18 = vcvt.s32.f32 %v546_v56  ;;  %v447_v56 = vld [vmem:[%s3453_s25 + $0xd8] sm:$0xff]  ;;  %v549_v30 = vunpack.c.0.s8 %v445_v45  ;;  %v550_v58 = vunpack.c.0.s8 %v446_v32 }
 0x145   : > { %1737 = vmatmul.bf16.gmra.mxu0 %v3545_v40  ;;  %v3787_v47 = vpack.c.bf16 %v673_v10, %v669_v46  ;;  %v554_v46 = vunpack.c.1.s8 %v446_v32 }
 0x146   : > { %1456 = vmatmul.bf16.gmra.mxu3 %v3773_v38  ;;  %v1328_v21 = vpop.f32.mrf.mxu2 }
 0x147   : > { %v1329_v24 = vadd.f32 %v1328_v21, %v1240_v29  ;;  %4307 = vst [vmem:[#allocation54_spill] sm:$0xff] %v3787_v47 }
 0x148   : > { %v1241_v63 = vpop.f32.mrf.mxu1 }
 0x149   : > { %v1417_v31 = vpop.f32.mrf.mxu3  ;;  %v1242_v6 = vadd.f32 %v1241_v63, %v3697_v55  ;;  %v3789_v55 = vpack.c.bf16 %v674_v18, %v670_v0  ;;  %v551_v0 = vunpack.c.0.s8 %v447_v56  ;;  %v555_v18 = vunpack.c.1.s8 %v447_v56 }
 0x14a   : > { %v1418_v17 = vadd.f32 %v1417_v31, %v1329_v24  ;;  %v1700_v40 = vpop.f32.mrf.mxu0  ;;  %v2241_v24 = vld [vmem:[#allocation11 + $0x58] sm:$0xff] }
 0x14b   : > { %4308 = vst [vmem:[#allocation55_spill] sm:$0xff] %v3789_v55  ;;  %2254 = vmatpush.msra.mxu0 %v2241_v24 }
 0x14c   : > { %v3785_v4 = vadd.f32 %v1698_v1, %v1418_v17  ;;  %v3791_v1 = vpack.c.bf16 %v675_v23, %v671_v60  ;;  %v677_v23 = vcvt.s32.f32 %v549_v30  ;;  %v2240_v30 = vld [vmem:[#allocation11 + $0x50] sm:$0xff] }
 0x14d   : > { %2255 = vmatpush.msra.mxu0 %v2240_v30 }
 0x14e   : > { %v1330_v29 = vpop.f32.mrf.mxu2  ;;  %4309 = vst [vmem:[#allocation56_spill] sm:$0xff] %v3791_v1 }
 0x14f   : > { %v1331_v41 = vadd.f32 %v1330_v29, %v1242_v6 }
 0x150   : > { %v1244_v39 = vpop.f32.mrf.mxu1 }
 0x151   : > { %v1419_v61 = vpop.f32.mrf.mxu3  ;;  %v1245_v50 = vadd.f32 %v1244_v39, %v3714_v7  ;;  %v553_v7 = vunpack.c.1.s8 %v445_v45  ;;  %v682_v39 = vcvt.s32.f32 %v554_v46 }
 0x152   : > { %v1420_v21 = vadd.f32 %v1419_v61, %v1331_v41  ;;  %v1703_v49 = vpop.f32.mrf.mxu0  ;;  %v678_v61 = vcvt.s32.f32 %v550_v58 }
 0x153   : > { %1283 = vmatmul.bf16.gmra.mxu1 %v3787_v47  ;;  %1372 = vmatmul.bf16.gmra.mxu2 %v3789_v55  ;;  %v681_v41 = vcvt.s32.f32 %v553_v7  ;;  %v2859_v7 = vld [vmem:[#allocation6 + $0xc0] sm:$0xff] }
 0x154   : > { %v3794_v31 = vadd.f32 %v1700_v40, %v1420_v21  ;;  %v679_v21 = vcvt.s32.f32 %v551_v0  ;;  %v3808_v55 = vpack.c.bf16 %v682_v39, %v678_v61  ;;  %1953 = vmatpush.bf16.msra.mxu3 %v2859_v7  ;;  %v563_v61 = vunpack.c.3.s8 %v447_v56 }
 0x155   : > { %1742 = vmatmul.bf16.gmra.mxu0 %v3563_v5 }
 0x156   : > { %4310 = vst [vmem:[#allocation57_spill] sm:$0xff] %v3794_v31  ;;  %1461 = vmatmul.bf16.gmra.mxu3 %v3791_v1  ;;  %v1333_v63 = vpop.f32.mrf.mxu2  ;;  %v3806_v1 = vpack.c.bf16 %v681_v41, %v677_v23  ;;  %v559_v41 = vunpack.c.2.s8 %v447_v56 }
 0x157   : > { %v1334_v17 = vadd.f32 %v1333_v63, %v1245_v50  ;;  %v683_v50 = vcvt.s32.f32 %v555_v18 }
 0x158   : > { %v1246_v10 = vpop.f32.mrf.mxu1 }
 0x159   : > { %v1422_v6 = vpop.f32.mrf.mxu3  ;;  %v1247_v60 = vadd.f32 %v1246_v10, %v3726_v42  ;;  %v557_v10 = vunpack.c.2.s8 %v445_v45 }
 0x15a   : > { %v1423_v40 = vadd.f32 %v1422_v6, %v1334_v17  ;;  %v1705_v31 = vpop.f32.mrf.mxu0  ;;  %v3810_v17 = vpack.c.bf16 %v683_v50, %v679_v21  ;;  %v2851_v6 = vld [vmem:[#allocation6 + $0x80] sm:$0xff] }
 0x15b   : > { %1864 = vmatpush.bf16.msra.mxu2 %v2851_v6  ;;  %v2843_v21 = vld [vmem:[#allocation6 + $0x40] sm:$0xff]  ;;  %v685_v50 = vcvt.s32.f32 %v557_v10  ;;  %v450_v10 = vld [vmem:[%s3453_s25 + $0xf0] sm:$0xff] }
 0x15c   : > { %v3804_v29 = vadd.f32 %v1703_v49, %v1423_v40  ;;  %v558_v40 = vunpack.c.2.s8 %v446_v32  ;;  %1775 = vmatpush.bf16.msra.mxu1 %v2843_v21  ;;  %v570_v21 = vunpack.c.1.s8 %v450_v10 }
 0x15e   : > { %v1335_v24 = vpop.f32.mrf.mxu2 }
 0x15f   : > { %v1336_v63 = vadd.f32 %v1335_v24, %v1247_v60  ;;  %v562_v60 = vunpack.c.3.s8 %v446_v32 }
 0x160   : > { %v1249_v47 = vpop.f32.mrf.mxu1 }
 0x161   : > { %v1424_v5 = vpop.f32.mrf.mxu3  ;;  %v1250_v58 = vadd.f32 %v1249_v47, %v3626_v62  ;;  %v686_v62 = vcvt.s32.f32 %v558_v40  ;;  %v690_v47 = vcvt.s32.f32 %v562_v60 }
 0x162   : > { %v1425_v42 = vadd.f32 %v1424_v5, %v1336_v63  ;;  %v687_v63 = vcvt.s32.f32 %v559_v41  ;;  %v691_v5 = vcvt.s32.f32 %v563_v61  ;;  %v566_v61 = vunpack.c.0.s8 %v450_v10 }
 0x163   : > { %1288 = vmatmul.bf16.gmra.mxu1 %v3806_v1  ;;  %1377 = vmatmul.bf16.gmra.mxu2 %v3808_v55  ;;  %v3824_v56 = vpack.c.bf16 %v690_v47, %v686_v62 }
 0x164   : > { %v3812_v49 = vadd.f32 %v1705_v31, %v1425_v42  ;;  %v561_v31 = vunpack.c.3.s8 %v445_v45  ;;  %v3826_v7 = vpack.c.bf16 %v691_v5, %v687_v63 }
 0x165   : > { %1747 = vmatmul.bf16.gmra.mxu0 %v3499_v33  ;;  %4311 = vst [vmem:[#allocation58_spill] sm:$0xff] %v3824_v56 }
 0x166   : > { %1466 = vmatmul.bf16.gmra.mxu3 %v3810_v17  ;;  %v1338_v46 = vpop.f32.mrf.mxu2  ;;  %v689_v24 = vcvt.s32.f32 %v561_v31  ;;  %4312 = vst [vmem:[#allocation59_spill] sm:$0xff] %v3826_v7 }
 0x167   : > { %v1339_v0 = vadd.f32 %v1338_v46, %v1250_v58  ;;  %v2239_v46 = vld [vmem:[#allocation11 + $0x48] sm:$0xff] }
 0x168   : > { %v1251_v23 = vpop.f32.mrf.mxu1  ;;  %v3822_v30 = vpack.c.bf16 %v689_v24, %v685_v50  ;;  %2256 = vmatpush.msra.mxu0 %v2239_v46 }
 0x169   : > { %v1427_v18 = vpop.f32.mrf.mxu3  ;;  %v1252_v33 = vadd.f32 %v1251_v23, %v3640_v19  ;;  %v449_v19 = vld [vmem:[%s3453_s25 + $0xe8] sm:$0xff] }
 0x16a   : > { %v3819_v39 = vadd.f32 %v1427_v18, %v1339_v0  ;;  %v451_v18 = vld [vmem:[%s3453_s25 + $0xf8] sm:$0xff]  ;;  %v565_v40 = vunpack.c.0.s8 %v449_v19  ;;  %v569_v41 = vunpack.c.1.s8 %v449_v19 }
 0x16b   : > { %v567_v24 = vunpack.c.0.s8 %v451_v18  ;;  %v571_v62 = vunpack.c.1.s8 %v451_v18 }
 0x16c   : > { %v693_v63 = vcvt.s32.f32 %v565_v40  ;;  %v697_v5 = vcvt.s32.f32 %v569_v41  ;;  %v2238_v40 = vld [vmem:[#allocation11 + $0x40] sm:$0xff]  ;;  %v573_v41 = vunpack.c.2.s8 %v449_v19 }
 0x16d   : > { %2257 = vmatpush.msra.mxu0 %v2238_v40 }
 0x16e   : > { %v1340_v45 = vpop.f32.mrf.mxu2 }
 0x16f   : > { %v1341_v32 = vadd.f32 %v1340_v45, %v1252_v33  ;;  %v694_v33 = vcvt.s32.f32 %v566_v61  ;;  %v698_v45 = vcvt.s32.f32 %v570_v21 }
 0x170   : > { %v1254_v6 = vpop.f32.mrf.mxu1 }
 0x171   : > { %v1429_v42 = vpop.f32.mrf.mxu3  ;;  %v1255_v0 = vadd.f32 %v1254_v6, %v3652_v44  ;;  %v695_v44 = vcvt.s32.f32 %v567_v24  ;;  %v574_v24 = vunpack.c.2.s8 %v450_v10 }
 0x172   : > { %v3828_v58 = vadd.f32 %v1429_v42, %v1341_v32  ;;  %v699_v32 = vcvt.s32.f32 %v571_v62  ;;  %v578_v62 = vunpack.c.3.s8 %v450_v10 }
 0x173   : > { %1293 = vmatmul.bf16.gmra.mxu1 %v3822_v30  ;;  %1382 = vmatmul.bf16.gmra.mxu2 %v3824_v56 }
 0x174   : > { %v3845_v56 = vpack.c.bf16 %v699_v32, %v695_v44  ;;  %v701_v44 = vcvt.s32.f32 %v573_v41  ;;  %v2237_v41 = vld [vmem:[#allocation11 + $0x38] sm:$0xff] }
 0x175   : > { %1752 = vmatmul.bf16.gmra.mxu0 %v3519_v3  ;;  %v3841_v3 = vpack.c.bf16 %v697_v5, %v693_v63  ;;  %v575_v5 = vunpack.c.2.s8 %v451_v18 }
 0x176   : > { %1471 = vmatmul.bf16.gmra.mxu3 %v3826_v7  ;;  %v1343_v31 = vpop.f32.mrf.mxu2  ;;  %2258 = vmatpush.msra.mxu0 %v2237_v41 }
 0x177   : > { %v1344_v60 = vadd.f32 %v1343_v31, %v1255_v0  ;;  %v3843_v31 = vpack.c.bf16 %v698_v45, %v694_v33  ;;  %v579_v33 = vunpack.c.3.s8 %v451_v18 }
 0x178   : > { %v1256_v50 = vpop.f32.mrf.mxu1 }
 0x179   : > { %v1432_v23 = vpop.f32.mrf.mxu3  ;;  %v1257_v42 = vadd.f32 %v1256_v50, %v3669_v59  ;;  %v577_v50 = vunpack.c.3.s8 %v449_v19 }
 0x17a   : > { %v3838_v47 = vadd.f32 %v1432_v23, %v1344_v60 }
 0x17b   : > { %v705_v32 = vcvt.s32.f32 %v577_v50 }
 0x17e   : > { %v1345_v6 = vpop.f32.mrf.mxu2 }
 0x17f   : > { %v1346_v46 = vadd.f32 %v1345_v6, %v1257_v42  ;;  %v702_v42 = vcvt.s32.f32 %v574_v24  ;;  %v706_v6 = vcvt.s32.f32 %v578_v62 }
 0x180   : > { %v1259_v7 = vpop.f32.mrf.mxu1 }
 0x181   : > { %v1434_v0 = vpop.f32.mrf.mxu3  ;;  %v1260_v59 = vadd.f32 %v1259_v7, %v3681_v25  ;;  %v707_v25 = vcvt.s32.f32 %v579_v33  ;;  %v3859_v19 = vpack.c.bf16 %v706_v6, %v702_v42  ;;  %v2236_v6 = vld [vmem:[#allocation11 + $0x30] sm:$0xff] }
 0x182   : > { %v3847_v60 = vadd.f32 %v1434_v0, %v1346_v46  ;;  %v703_v46 = vcvt.s32.f32 %v575_v5  ;;  %2259 = vmatpush.msra.mxu0 %v2236_v6 }
 0x183   : > { %1298 = vmatmul.bf16.gmra.mxu1 %v3841_v3  ;;  %1387 = vmatmul.bf16.gmra.mxu2 %v3843_v31 }
 0x185   : > { %1757 = vmatmul.bf16.gmra.mxu0 %v3547_v43  ;;  %v3857_v43 = vpack.c.bf16 %v705_v32, %v701_v44 }
 0x186   : > { %1476 = vmatmul.bf16.gmra.mxu3 %v3845_v56  ;;  %v1348_v23 = vpop.f32.mrf.mxu2 }
 0x187   : > { %v1349_v61 = vadd.f32 %v1348_v23, %v1260_v59  ;;  %v3861_v23 = vpack.c.bf16 %v707_v25, %v703_v46 }
 0x188   : > { %v1261_v63 = vpop.f32.mrf.mxu1 }
 0x189   : > { %v1437_v21 = vpop.f32.mrf.mxu3  ;;  %v1262_v7 = vadd.f32 %v1261_v63, %v3695_v16 }
 0x18a   : > { %v3854_v45 = vadd.f32 %v1437_v21, %v1349_v61 }
 0x18e   : > { %v1350_v0 = vpop.f32.mrf.mxu2 }
 0x18f   : > { %v1351_v40 = vadd.f32 %v1350_v0, %v1262_v7 }
 0x190   : > { %v1264_v10 = vpop.f32.mrf.mxu1 }
 0x191   : > { %v1439_v59 = vpop.f32.mrf.mxu3  ;;  %v1265_v16 = vadd.f32 %v1264_v10, %v3707_v2 }
 0x192   : > { %v3863_v18 = vadd.f32 %v1439_v59, %v1351_v40 }
 0x193   : > { %1303 = vmatmul.bf16.gmra.mxu1 %v3857_v43  ;;  %1392 = vmatmul.bf16.gmra.mxu2 %v3859_v19 }
 0x195   : > { %1762 = vmatmul.bf16.gmra.mxu0 %v3565_v9 }
 0x196   : > { %1481 = vmatmul.bf16.gmra.mxu3 %v3861_v23  ;;  %v1353_v61 = vpop.f32.mrf.mxu2 }
 0x197   : > { %v1354_v21 = vadd.f32 %v1353_v61, %v1265_v16 }
 0x198   : > { %v1266_v24 = vpop.f32.mrf.mxu1 }
 0x199   : > { %v1442_v50 = vpop.f32.mrf.mxu3  ;;  %v1267_v63 = vadd.f32 %v1266_v24, %v3724_v12  ;;  %v3891_v24 = vpop.f32.mrf.mxu0 }
 0x19a   : > { %v3870_v62 = vadd.f32 %v1442_v50, %v1354_v21 }
 0x19e   : > { %v1355_v5 = vpop.f32.mrf.mxu2 }
 0x19f   : > { %v1356_v33 = vadd.f32 %v1355_v5, %v1267_v63 }
 0x1a0   : > { %v1269_v32 = vpop.f32.mrf.mxu1 }
 0x1a1   : > { %v1444_v44 = vpop.f32.mrf.mxu3  ;;  %v1270_v9 = vadd.f32 %v1269_v32, %v3635_v8  ;;  %v3899_v6 = vpop.f32.mrf.mxu0 }
 0x1a2   : > { %v3873_v42 = vadd.f32 %v1444_v44, %v1356_v33 }
 0x1a3   : > { %1776 = vmatmul.bf16.vlgmr.msra.gmra.mxu1 %v3576_v26  ;;  %1865 = vmatmul.bf16.vlgmr.msra.gmra.mxu2 %v3578_v27  ;;  %v2235_v26 = vld [vmem:[#allocation11 + $0x28] sm:$0xff] }
 0x1a4   : > { %2260 = vmatpush.msra.mxu0 %v2235_v26 }
 0x1a6   : > { %1954 = vmatmul.bf16.vlgmr.msra.gmra.mxu3 %v3580_v28  ;;  %v1358_v2 = vpop.f32.mrf.mxu2 }
 0x1a7   : > { %v1359_v46 = vadd.f32 %v1358_v2, %v1270_v9 }
 0x1a8   : > { %v1271_v12 = vpop.f32.mrf.mxu1 }
 0x1a9   : > { %v1447_v25 = vpop.f32.mrf.mxu3  ;;  %v1272_v0 = vadd.f32 %v1271_v12, %v3644_v34 }
 0x1aa   : > { %v3879_v7 = vadd.f32 %v1447_v25, %v1359_v46 }
 0x1ae   : > { %v1360_v40 = vpop.f32.mrf.mxu2 }
 0x1af   : > { %v1361_v59 = vadd.f32 %v1360_v40, %v1272_v0 }
 0x1b0   : > { %v1274_v41 = vpop.f32.mrf.mxu1 }
 0x1b1   : > { %v1449_v10 = vpop.f32.mrf.mxu3  ;;  %v1275_v27 = vadd.f32 %v1274_v41, %v3664_v51 }
 0x1b2   : > { %v3882_v16 = vadd.f32 %v1449_v10, %v1361_v59  ;;  %v4314_v59 = vld [vmem:[#allocation23_spill] sm:$0xff]  ;;  %v4315_v10 = vld [vmem:[#allocation42_spill] sm:$0xff] }
 0x1b3   : > { %1781 = vmatmul.bf16.gmra.mxu1 %v3586_v52  ;;  %1870 = vmatmul.bf16.gmra.mxu2 %v3588_v53  ;;  %v2234_v53 = vld [vmem:[#allocation11 + $0x20] sm:$0xff] }
 0x1b4   : > { %2261 = vmatpush.msra.mxu0 %v2234_v53  ;;  %v2232_v53 = vld [vmem:[#allocation11 + $0x10] sm:$0xff] }
 0x1b6   : > { %1959 = vmatmul.bf16.gmra.mxu3 %v3590_v37  ;;  %v1363_v28 = vpop.f32.mrf.mxu2 }
 0x1b7   : > { %v1364_v8 = vadd.f32 %v1363_v28, %v1275_v27 }
 0x1b8   : > { %v1276_v34 = vpop.f32.mrf.mxu1 }
 0x1b9   : > { %v1452_v61 = vpop.f32.mrf.mxu3  ;;  %v1277_v50 = vadd.f32 %v1276_v34, %v3673_v22  ;;  %v4316_v34 = vld [vmem:[#allocation44_spill] sm:$0xff] }
 0x1ba   : > { %v3888_v21 = vadd.f32 %v1452_v61, %v1364_v8 }
 0x1be   : > { %v1365_v63 = vpop.f32.mrf.mxu2 }
 0x1bf   : > { %v1366_v5 = vadd.f32 %v1365_v63, %v1277_v50 }
 0x1c0   : > { %v1279_v52 = vpop.f32.mrf.mxu1 }
 0x1c1   : > { %v1454_v33 = vpop.f32.mrf.mxu3  ;;  %v1280_v37 = vadd.f32 %v1279_v52, %v3690_v57  ;;  %v4313_v57 = vld [vmem:[#allocation22_spill] sm:$0xff] }
 0x1c2   : > { %v3893_v44 = vadd.f32 %v1454_v33, %v1366_v5 }
 0x1c3   : > { %1786 = vmatmul.bf16.gmra.mxu1 %v3599_v13  ;;  %1875 = vmatmul.bf16.gmra.mxu2 %v3601_v14  ;;  %v2233_v14 = vld [vmem:[#allocation11 + $0x18] sm:$0xff] }
 0x1c4   : > { %2262 = vmatpush.msra.mxu0 %v2233_v14 }
 0x1c6   : > { %1964 = vmatmul.bf16.gmra.mxu3 %v3603_v15  ;;  %v1368_v51 = vpop.f32.mrf.mxu2  ;;  %v3906_v15 = vpop.f32.mrf.mxu0  ;;  %2263 = vmatpush.msra.mxu0 %v2232_v53 }
 0x1c7   : > { %v1369_v22 = vadd.f32 %v1368_v51, %v1280_v37  ;;  %v4317_v37 = vld [vmem:[#allocation24_spill] sm:$0xff]  ;;  %v4318_v51 = vld [vmem:[#allocation25_spill] sm:$0xff] }
 0x1c8   : > { %v1281_v9 = vpop.f32.mrf.mxu1 }
 0x1c9   : > { %v1457_v32 = vpop.f32.mrf.mxu3  ;;  %v1282_v46 = vadd.f32 %v1281_v9, %v3699_v48 }
 0x1ca   : > { %v3901_v2 = vadd.f32 %v1457_v32, %v1369_v22  ;;  %v4319_v22 = vld [vmem:[#allocation26_spill] sm:$0xff]  ;;  %v4320_v32 = vld [vmem:[#allocation27_spill] sm:$0xff] }
 0x1ce   : > { %v1370_v25 = vpop.f32.mrf.mxu2  ;;  %v3914_v61 = vpop.f32.mrf.mxu0 }
 0x1cf   : > { %v1371_v12 = vadd.f32 %v1370_v25, %v1282_v46 }
 0x1d0   : > { %v1284_v13 = vpop.f32.mrf.mxu1 }
 0x1d1   : > { %v1459_v0 = vpop.f32.mrf.mxu3  ;;  %v1285_v41 = vadd.f32 %v1284_v13, %v4315_v10 }
 0x1d2   : > { %v3904_v40 = vadd.f32 %v1459_v0, %v1371_v12 }
 0x1d3   : > { %1791 = vmatmul.bf16.gmra.mxu1 %v3609_v36  ;;  %1880 = vmatmul.bf16.gmra.mxu2 %v4313_v57  ;;  %v4322_v57 = vld [vmem:[#allocation28_spill] sm:$0xff] }
 0x1d6   : > { %1969 = vmatmul.bf16.gmra.mxu3 %v4314_v59  ;;  %v1373_v26 = vpop.f32.mrf.mxu2  ;;  %v3923_v46 = vpop.f32.mrf.mxu0 }
 0x1d7   : > { %v1374_v48 = vadd.f32 %v1373_v26, %v1285_v41 }
 0x1d8   : > { %v1286_v28 = vpop.f32.mrf.mxu1 }
 0x1d9   : > { %v1462_v27 = vpop.f32.mrf.mxu3  ;;  %v1287_v50 = vadd.f32 %v1286_v28, %v4316_v34  ;;  %v2231_v34 = vld [vmem:[#allocation11 + $0x8] sm:$0xff] }
 0x1da   : > { %v3912_v8 = vadd.f32 %v1462_v27, %v1374_v48  ;;  %2264 = vmatpush.msra.mxu0 %v2231_v34 }
 0x1de   : > { %v1375_v63 = vpop.f32.mrf.mxu2  ;;  %v3928_v48 = vpop.f32.mrf.mxu0 }
 0x1df   : > { %v1376_v5 = vadd.f32 %v1375_v63, %v1287_v50  ;;  %v4324_v50 = vld [vmem:[#allocation29_spill] sm:$0xff]  ;;  %v4325_v63 = vld [vmem:[#allocation30_spill] sm:$0xff] }
 0x1e0   : > { %v1289_v36 = vpop.f32.mrf.mxu1 }
 0x1e1   : > { %v1464_v33 = vpop.f32.mrf.mxu3  ;;  %v1290_v9 = vadd.f32 %v1289_v36, %v4320_v32 }
 0x1e2   : > { %v3917_v52 = vadd.f32 %v1464_v33, %v1376_v5  ;;  %v4326_v5 = vld [vmem:[#allocation31_spill] sm:$0xff]  ;;  %v4327_v33 = vld [vmem:[#allocation32_spill] sm:$0xff] }
 0x1e3   : > { %1796 = vmatmul.bf16.gmra.mxu1 %v4317_v37  ;;  %1885 = vmatmul.bf16.gmra.mxu2 %v4318_v51 }
 0x1e6   : > { %1974 = vmatmul.bf16.gmra.mxu3 %v4319_v22  ;;  %v1378_v25 = vpop.f32.mrf.mxu2 }
 0x1e7   : > { %v1379_v12 = vadd.f32 %v1378_v25, %v1290_v9  ;;  %v3938_v9 = vpop.f32.mrf.mxu0  ;;  %v4329_v25 = vld [vmem:[#allocation33_spill] sm:$0xff] }
 0x1e8   : > { %v1291_v13 = vpop.f32.mrf.mxu1 }
 0x1e9   : > { %v1467_v0 = vpop.f32.mrf.mxu3  ;;  %v1292_v59 = vadd.f32 %v1291_v13, %v4322_v57 }
 0x1ea   : > { %v3925_v14 = vadd.f32 %v1467_v0, %v1379_v12 }
 0x1ec   : > { %4321 = vst [vmem:[#allocation22_spill] sm:$0xff] %v3925_v14 }
 0x1ee   : > { %v1380_v10 = vpop.f32.mrf.mxu2 }
 0x1ef   : > { %v1381_v41 = vadd.f32 %v1380_v10, %v1292_v59  ;;  %v3945_v34 = vpop.f32.mrf.mxu0 }
 0x1f0   : > { %v1294_v27 = vpop.f32.mrf.mxu1 }
 0x1f1   : > { %v1469_v26 = vpop.f32.mrf.mxu3  ;;  %v1295_v36 = vadd.f32 %v1294_v27, %v4327_v33  ;;  %v4332_v27 = vld [vmem:[#allocation35_spill] sm:$0xff] }
 0x1f2   : > { %v3930_v28 = vadd.f32 %v1469_v26, %v1381_v41  ;;  %v2230_v41 = vld [vmem:[#allocation11] sm:$0xff] }
 0x1f3   : > { %1801 = vmatmul.bf16.gmra.mxu1 %v4324_v50  ;;  %1890 = vmatmul.bf16.gmra.mxu2 %v4325_v63  ;;  %v4331_v26 = vld [vmem:[#allocation34_spill] sm:$0xff]  ;;  %v4333_v50 = vld [vmem:[#allocation36_spill] sm:$0xff]  ;;  %v4334_v63 = vld [vmem:[#allocation37_spill] sm:$0xff] }
 0x1f4   : > { %4323 = vst [vmem:[#allocation23_spill] sm:$0xff] %v3930_v28  ;;  %2265 = vmatpush.msra.mxu0 %v2230_v41 }
 0x1f6   : > { %1979 = vmatmul.bf16.gmra.mxu3 %v4326_v5  ;;  %v1383_v53 = vpop.f32.mrf.mxu2 }
 0x1f7   : > { %v1384_v37 = vadd.f32 %v1383_v53, %v1295_v36 }
 0x1f8   : > { %v1296_v22 = vpop.f32.mrf.mxu1 }
 0x1f9   : > { %v1472_v51 = vpop.f32.mrf.mxu3  ;;  %v1297_v12 = vadd.f32 %v1296_v22, %v4329_v25  ;;  %v4336_v22 = vld [vmem:[#allocation38_spill] sm:$0xff] }
 0x1fa   : > { %v3936_v32 = vadd.f32 %v1472_v51, %v1384_v37 }
 0x1fc   : > { %4328 = vst [vmem:[#allocation42_spill] sm:$0xff] %v3936_v32 }
 0x1fe   : > { %v1385_v0 = vpop.f32.mrf.mxu2 }
 0x1ff   : > { %v1386_v13 = vadd.f32 %v1385_v0, %v1297_v12  ;;  %v3952_v12 = vpop.f32.mrf.mxu0 }
 0x200   : > { %v1299_v59 = vpop.f32.mrf.mxu1 }
 0x201   : > { %v1474_v57 = vpop.f32.mrf.mxu3  ;;  %v1300_v5 = vadd.f32 %v1299_v59, %v4334_v63  ;;  %v4340_v59 = vld [vmem:[#allocation41_spill] sm:$0xff]  ;;  %v4341_v63 = vld [vmem:[#allocation43_spill] sm:$0xff] }
 0x202   : > { %v3941_v10 = vadd.f32 %v1474_v57, %v1386_v13 }
 0x203   : > { %1806 = vmatmul.bf16.gmra.mxu1 %v4331_v26  ;;  %1895 = vmatmul.bf16.gmra.mxu2 %v4332_v27  ;;  %v4338_v27 = vld [vmem:[#allocation39_spill] sm:$0xff] }
 0x204   : > { %4330 = vst [vmem:[#allocation44_spill] sm:$0xff] %v3941_v10 }
 0x206   : > { %1984 = vmatmul.bf16.gmra.mxu3 %v4333_v50  ;;  %v1388_v33 = vpop.f32.mrf.mxu2  ;;  %v4339_v50 = vld [vmem:[#allocation40_spill] sm:$0xff] }
 0x207   : > { %v1389_v36 = vadd.f32 %v1388_v33, %v1300_v5 }
 0x208   : > { %v1301_v37 = vpop.f32.mrf.mxu1 }
 0x209   : > { %v1477_v53 = vpop.f32.mrf.mxu3  ;;  %v1302_v25 = vadd.f32 %v1301_v37, %v4336_v22  ;;  %v3960_v37 = vpop.f32.mrf.mxu0 }
 0x20a   : > { %v3949_v51 = vadd.f32 %v1477_v53, %v1389_v36 }
 0x20c   : > { %4335 = vst [vmem:[#allocation24_spill] sm:$0xff] %v3949_v51 }
 0x20e   : > { %v1390_v0 = vpop.f32.mrf.mxu2 }
 0x20f   : > { %v1391_v13 = vadd.f32 %v1390_v0, %v1302_v25  ;;  %v4343_v0 = vld [vmem:[#allocation45_spill] sm:$0xff] }
 0x210   : > { %v1304_v41 = vpop.f32.mrf.mxu1 }
 0x211   : > { %v1479_v57 = vpop.f32.mrf.mxu3  ;;  %v1305_v5 = vadd.f32 %v1304_v41, %v4341_v63  ;;  %v4345_v41 = vld [vmem:[#allocation46_spill] sm:$0xff]  ;;  %v4346_v63 = vld [vmem:[#allocation47_spill] sm:$0xff] }
 0x212   : > { %v3954_v26 = vadd.f32 %v1479_v57, %v1391_v13 }
 0x213   : > { %1811 = vmatmul.bf16.gmra.mxu1 %v4338_v27  ;;  %1900 = vmatmul.bf16.gmra.mxu2 %v4339_v50 }
 0x214   : > { %4337 = vst [vmem:[#allocation25_spill] sm:$0xff] %v3954_v26 }
 0x216   : > { %1989 = vmatmul.bf16.gmra.mxu3 %v4340_v59  ;;  %v1393_v33 = vpop.f32.mrf.mxu2  ;;  %v3967_v59 = vpop.f32.mrf.mxu0 }
 0x217   : > { %v1394_v36 = vadd.f32 %v1393_v33, %v1305_v5  ;;  %v4347_v5 = vld [vmem:[#allocation48_spill] sm:$0xff]  ;;  %v4348_v33 = vld [vmem:[#allocation49_spill] sm:$0xff] }
 0x218   : > { %v1306_v22 = vpop.f32.mrf.mxu1 }
 0x219   : > { %v1482_v53 = vpop.f32.mrf.mxu3  ;;  %v1307_v13 = vadd.f32 %v1306_v22, %v4343_v0  ;;  %v2102_v0 = vld [vmem:[%s3465_s10] sm:$0xff] }
 0x21a   : > { %v3962_v25 = vadd.f32 %v1482_v53, %v1394_v36 }
 0x21c   : > { %4342 = vst [vmem:[#allocation26_spill] sm:$0xff] %v3962_v25 }
 0x21e   : > { %v1395_v57 = vpop.f32.mrf.mxu2 }
 0x21f   : > { %v1396_v26 = vadd.f32 %v1395_v57, %v1307_v13 }
 0x220   : > { %v1777_v51 = vpop.f32.mrf.mxu1 }
 0x221   : > { %v1484_v27 = vpop.f32.mrf.mxu3  ;;  %v1778_v36 = vadd.f32 %v1777_v51, %v4348_v33 }
 0x222   : > { %v3965_v50 = vadd.f32 %v1484_v27, %v1396_v26  ;;  %v3974_v26 = vpop.f32.mrf.mxu0 }
 0x223   : > { %1816 = vmatmul.bf16.gmra.mxu1 %v4345_v41  ;;  %1905 = vmatmul.bf16.gmra.mxu2 %v4346_v63 }
 0x224   : > { %4344 = vst [vmem:[#allocation27_spill] sm:$0xff] %v3965_v50  ;;  %v4349_v50 = vld [vmem:[#allocation53_spill] sm:$0xff] }
 0x226   : > { %1994 = vmatmul.bf16.gmra.mxu3 %v4347_v5  ;;  %v1866_v53 = vpop.f32.mrf.mxu2  ;;  %v2103_v5 = vld [vmem:[%s3465_s10 + $0x8] sm:$0xff] }
 0x227   : > { %v1867_v25 = vadd.f32 %v1866_v53, %v1778_v36  ;;  %v4350_v36 = vld [vmem:[#allocation50_spill] sm:$0xff]  ;;  %v4351_v53 = vld [vmem:[#allocation51_spill] sm:$0xff] }
 0x228   : > { %v1779_v13 = vpop.f32.mrf.mxu1 }
 0x229   : > { %v1955_v22 = vpop.f32.mrf.mxu3  ;;  %v1780_v32 = vadd.f32 %v1779_v13, %v4349_v50 }
 0x22a   : > { %v1956_v57 = vadd.f32 %v1955_v22, %v1867_v25  ;;  %v4352_v25 = vld [vmem:[#allocation52_spill] sm:$0xff] }
 0x22c   : > { %v2166_v10 = vadd.f32 %v2102_v0, %v1956_v57  ;;  %v3982_v0 = vpop.f32.mrf.mxu0  ;;  %v2104_v57 = vld [vmem:[%s3465_s10 + $0x10] sm:$0xff] }
 0x22e   : > { %v2198_v27 = vmax.f32 %v2166_v10, 0.0  ;;  %v1868_v41 = vpop.f32.mrf.mxu2 }
 0x22f   : > { %v1869_v28 = vadd.f32 %v1868_v41, %v1780_v32 }
 0x230   : > { %2266 = vmatmul.f32.vlgmr.msra.gmra.mxu0 %v2198_v27  ;;  %v1782_v14 = vpop.f32.mrf.mxu1 }
 0x231   : > { %v1957_v63 = vpop.f32.mrf.mxu3  ;;  %v1783_v22 = vadd.f32 %v1782_v14, %v3767_v20  ;;  %v2105_v14 = vld [vmem:[%s3465_s10 + $0x18] sm:$0xff] }
 0x232   : > { %v1958_v51 = vadd.f32 %v1957_v63, %v1869_v28 }
 0x233   : > { %1821 = vmatmul.bf16.gmra.mxu1 %v4350_v36  ;;  %1910 = vmatmul.bf16.gmra.mxu2 %v4351_v53 }
 0x234   : > { %v2167_v33 = vadd.f32 %v2103_v5, %v1958_v51  ;;  %v3986_v20 = vpop.f32.mrf.mxu0 }
 0x236   : > { %1999 = vmatmul.bf16.gmra.mxu3 %v4352_v25  ;;  %v2199_v10 = vmax.f32 %v2167_v33, 0.0  ;;  %v1871_v32 = vpop.f32.mrf.mxu2 }
 0x237   : > { %v1872_v50 = vadd.f32 %v1871_v32, %v1783_v22 }
 0x238   : > { %2269 = vmatmul.f32.gmra.mxu0 %v2199_v10  ;;  %v1784_v27 = vpop.f32.mrf.mxu1 }
 0x239   : > { %v1960_v13 = vpop.f32.mrf.mxu3  ;;  %v1785_v5 = vadd.f32 %v1784_v27, %v3776_v54 }
 0x23a   : > { %v1961_v28 = vadd.f32 %v1960_v13, %v1872_v50 }
 0x23c   : > { %v2168_v41 = vadd.f32 %v2104_v57, %v1961_v28  ;;  %v2106_v57 = vld [vmem:[%s3465_s10 + $0x20] sm:$0xff] }
 0x23e   : > { %v2200_v63 = vmax.f32 %v2168_v41, 0.0  ;;  %v1873_v51 = vpop.f32.mrf.mxu2  ;;  %v3994_v41 = vpop.f32.mrf.mxu0 }
 0x23f   : > { %v1874_v36 = vadd.f32 %v1873_v51, %v1785_v5 }
 0x240   : > { %2272 = vmatmul.f32.gmra.mxu0 %v2200_v63  ;;  %v1787_v33 = vpop.f32.mrf.mxu1 }
 0x241   : > { %v1962_v53 = vpop.f32.mrf.mxu3  ;;  %v1788_v10 = vadd.f32 %v1787_v33, %v3785_v4  ;;  %v2107_v4 = vld [vmem:[%s3465_s10 + $0x28] sm:$0xff] }
 0x242   : > { %v1963_v25 = vadd.f32 %v1962_v53, %v1874_v36 }
 0x243   : > { %1826 = vmatmul.bf16.gmra.mxu1 %v3769_v35  ;;  %1915 = vmatmul.bf16.gmra.mxu2 %v3771_v11  ;;  %v4353_v35 = vld [vmem:[#allocation57_spill] sm:$0xff] }
 0x244   : > { %v2169_v22 = vadd.f32 %v2105_v14, %v1963_v25  ;;  %v4354_v25 = vld [vmem:[#allocation54_spill] sm:$0xff] }
 0x246   : > { %2004 = vmatmul.bf16.gmra.mxu3 %v3773_v38  ;;  %v2201_v54 = vmax.f32 %v2169_v22, 0.0  ;;  %v1876_v32 = vpop.f32.mrf.mxu2  ;;  %v4355_v22 = vld [vmem:[#allocation55_spill] sm:$0xff] }
 0x247   : > { %v1877_v50 = vadd.f32 %v1876_v32, %v1788_v10  ;;  %v4000_v10 = vpop.f32.mrf.mxu0 }
 0x248   : > { %2275 = vmatmul.f32.gmra.mxu0 %v2201_v54  ;;  %v1789_v27 = vpop.f32.mrf.mxu1  ;;  %v4356_v54 = vld [vmem:[#allocation56_spill] sm:$0xff] }
 0x249   : > { %v1965_v13 = vpop.f32.mrf.mxu3  ;;  %v1790_v51 = vadd.f32 %v1789_v27, %v4353_v35 }
 0x24a   : > { %v1966_v28 = vadd.f32 %v1965_v13, %v1877_v50 }
 0x24c   : > { %v2170_v63 = vadd.f32 %v2106_v57, %v1966_v28  ;;  %v2108_v28 = vld [vmem:[%s3465_s10 + $0x30] sm:$0xff] }
 0x24e   : > { %v2202_v5 = vmax.f32 %v2170_v63, 0.0  ;;  %v1878_v11 = vpop.f32.mrf.mxu2 }
 0x24f   : > { %v1879_v36 = vadd.f32 %v1878_v11, %v1790_v51 }
 0x250   : > { %2278 = vmatmul.f32.gmra.mxu0 %v2202_v5  ;;  %v1792_v53 = vpop.f32.mrf.mxu1 }
 0x251   : > { %v1967_v38 = vpop.f32.mrf.mxu3  ;;  %v1793_v32 = vadd.f32 %v1792_v53, %v3804_v29  ;;  %v2109_v29 = vld [vmem:[%s3465_s10 + $0x38] sm:$0xff] }
 0x252   : > { %v1968_v14 = vadd.f32 %v1967_v38, %v1879_v36  ;;  %v4006_v36 = vpop.f32.mrf.mxu0 }
 0x253   : > { %1831 = vmatmul.bf16.gmra.mxu1 %v4354_v25  ;;  %1920 = vmatmul.bf16.gmra.mxu2 %v4355_v22  ;;  %v1709_v25 = vadd.f32 %v3891_v24, %v3819_v39  ;;  %v1711_v39 = vadd.f32 %v3899_v6, %v3828_v58  ;;  %v4357_v58 = vld [vmem:[#allocation58_spill] sm:$0xff]  ;;  %v4358_v6 = vld [vmem:[#allocation59_spill] sm:$0xff] }
 0x254   : > { %v2171_v33 = vadd.f32 %v2107_v4, %v1968_v14 }
 0x256   : > { %2009 = vmatmul.bf16.gmra.mxu3 %v4356_v54  ;;  %v2203_v50 = vmax.f32 %v2171_v33, 0.0  ;;  %v1881_v13 = vpop.f32.mrf.mxu2 }
 0x257   : > { %v1882_v57 = vadd.f32 %v1881_v13, %v1793_v32 }
 0x258   : > { %2281 = vmatmul.f32.gmra.mxu0 %v2203_v50  ;;  %v1794_v63 = vpop.f32.mrf.mxu1 }
 0x259   : > { %v1970_v27 = vpop.f32.mrf.mxu3  ;;  %v1795_v11 = vadd.f32 %v1794_v63, %v3812_v49 }
 0x25a   : > { %v1971_v5 = vadd.f32 %v1970_v27, %v1882_v57  ;;  %v4014_v57 = vpop.f32.mrf.mxu0  ;;  %v2110_v27 = vld [vmem:[%s3465_s10 + $0x40] sm:$0xff] }
 0x25c   : > { %v2172_v35 = vadd.f32 %v2108_v28, %v1971_v5 }
 0x25e   : > { %v2204_v51 = vmax.f32 %v2172_v35, 0.0  ;;  %v1883_v38 = vpop.f32.mrf.mxu2 }
 0x25f   : > { %v1884_v4 = vadd.f32 %v1883_v38, %v1795_v11 }
 0x260   : > { %2284 = vmatmul.f32.gmra.mxu0 %v2204_v51  ;;  %v1797_v53 = vpop.f32.mrf.mxu1  ;;  %v2111_v51 = vld [vmem:[%s3465_s10 + $0x48] sm:$0xff] }
 0x261   : > { %v1972_v14 = vpop.f32.mrf.mxu3  ;;  %v1798_v49 = vadd.f32 %v1797_v53, %v1709_v25 }
 0x262   : > { %v1973_v33 = vadd.f32 %v1972_v14, %v1884_v4  ;;  %v4020_v4 = vpop.f32.mrf.mxu0  ;;  %v1714_v14 = vadd.f32 %v3906_v15, %v3838_v47  ;;  %v1716_v47 = vadd.f32 %v3914_v61, %v3847_v60 }
 0x263   : > { %1836 = vmatmul.bf16.gmra.mxu1 %v3806_v1  ;;  %1925 = vmatmul.bf16.gmra.mxu2 %v3808_v55 }
 0x264   : > { %v2173_v22 = vadd.f32 %v2109_v29, %v1973_v33 }
 0x266   : > { %2014 = vmatmul.bf16.gmra.mxu3 %v3810_v17  ;;  %v2205_v54 = vmax.f32 %v2173_v22, 0.0  ;;  %v1886_v32 = vpop.f32.mrf.mxu2 }
 0x267   : > { %v1887_v50 = vadd.f32 %v1886_v32, %v1798_v49 }
 0x268   : > { %2287 = vmatmul.f32.gmra.mxu0 %v2205_v54  ;;  %v1799_v28 = vpop.f32.mrf.mxu1  ;;  %v2112_v54 = vld [vmem:[%s3465_s10 + $0x50] sm:$0xff] }
 0x269   : > { %v1975_v13 = vpop.f32.mrf.mxu3  ;;  %v1800_v55 = vadd.f32 %v1799_v28, %v1711_v39 }
 0x26a   : > { %v1976_v63 = vadd.f32 %v1975_v13, %v1887_v50  ;;  %v4030_v13 = vpop.f32.mrf.mxu0 }
 0x26c   : > { %v2174_v1 = vadd.f32 %v2110_v27, %v1976_v63 }
 0x26e   : > { %v2206_v24 = vmax.f32 %v2174_v1, 0.0  ;;  %v1888_v5 = vpop.f32.mrf.mxu2  ;;  %v2113_v1 = vld [vmem:[%s3465_s10 + $0x58] sm:$0xff] }
 0x26f   : > { %v1889_v17 = vadd.f32 %v1888_v5, %v1800_v55  ;;  %v1719_v5 = vadd.f32 %v3923_v46, %v3854_v45  ;;  %v1721_v45 = vadd.f32 %v3928_v48, %v3863_v18 }
 0x270   : > { %2290 = vmatmul.f32.gmra.mxu0 %v2206_v24  ;;  %v1802_v11 = vpop.f32.mrf.mxu1 }
 0x271   : > { %v1977_v35 = vpop.f32.mrf.mxu3  ;;  %v1803_v33 = vadd.f32 %v1802_v11, %v1714_v14  ;;  %v2114_v14 = vld [vmem:[%s3465_s10 + $0x60] sm:$0xff] }
 0x272   : > { %v1978_v38 = vadd.f32 %v1977_v35, %v1889_v17  ;;  %v4038_v35 = vpop.f32.mrf.mxu0 }
 0x273   : > { %1841 = vmatmul.bf16.gmra.mxu1 %v3822_v30  ;;  %1930 = vmatmul.bf16.gmra.mxu2 %v4357_v58 }
 0x274   : > { %v2175_v29 = vadd.f32 %v2111_v51, %v1978_v38 }
 0x276   : > { %2019 = vmatmul.bf16.gmra.mxu3 %v4358_v6  ;;  %v2207_v53 = vmax.f32 %v2175_v29, 0.0  ;;  %v1891_v25 = vpop.f32.mrf.mxu2 }
 0x277   : > { %v1892_v22 = vadd.f32 %v1891_v25, %v1803_v33  ;;  %v2115_v25 = vld [vmem:[%s3465_s10 + $0x68] sm:$0xff] }
 0x278   : > { %2293 = vmatmul.f32.gmra.mxu0 %v2207_v53  ;;  %v1804_v32 = vpop.f32.mrf.mxu1 }
 0x279   : > { %v1980_v49 = vpop.f32.mrf.mxu3  ;;  %v1805_v27 = vadd.f32 %v1804_v32, %v1716_v47 }
 0x27a   : > { %v1981_v50 = vadd.f32 %v1980_v49, %v1892_v22  ;;  %v4043_v33 = vpop.f32.mrf.mxu0 }
 0x27c   : > { %v2176_v15 = vadd.f32 %v2112_v54, %v1981_v50  ;;  %v1724_v54 = vadd.f32 %v3938_v9, %v3870_v62  ;;  %v1726_v62 = vadd.f32 %v3945_v34, %v3873_v42 }
 0x27e   : > { %v2208_v30 = vmax.f32 %v2176_v15, 0.0  ;;  %v1893_v28 = vpop.f32.mrf.mxu2 }
 0x27f   : > { %v1894_v63 = vadd.f32 %v1893_v28, %v1805_v27 }
 0x280   : > { %2296 = vmatmul.f32.gmra.mxu0 %v2208_v30  ;;  %v1807_v24 = vpop.f32.mrf.mxu1  ;;  %v2116_v30 = vld [vmem:[%s3465_s10 + $0x70] sm:$0xff] }
 0x281   : > { %v1982_v39 = vpop.f32.mrf.mxu3  ;;  %v1808_v61 = vadd.f32 %v1807_v24, %v1719_v5  ;;  %v2117_v24 = vld [vmem:[%s3465_s10 + $0x78] sm:$0xff] }
 0x282   : > { %v1983_v55 = vadd.f32 %v1982_v39, %v1894_v63  ;;  %v4052_v63 = vpop.f32.mrf.mxu0 }
 0x283   : > { %1846 = vmatmul.bf16.gmra.mxu1 %v3841_v3  ;;  %1935 = vmatmul.bf16.gmra.mxu2 %v3843_v31 }
 0x284   : > { %v2177_v17 = vadd.f32 %v2113_v1, %v1983_v55 }
 0x286   : > { %2024 = vmatmul.bf16.gmra.mxu3 %v3845_v56  ;;  %v2209_v60 = vmax.f32 %v2177_v17, 0.0  ;;  %v1896_v51 = vpop.f32.mrf.mxu2  ;;  %v1729_v17 = vadd.f32 %v3952_v12, %v3879_v7  ;;  %v1731_v7 = vadd.f32 %v3960_v37, %v3882_v16  ;;  %v1734_v16 = vadd.f32 %v3967_v59, %v3888_v21 }
 0x287   : > { %v1897_v11 = vadd.f32 %v1896_v51, %v1808_v61 }
 0x288   : > { %2299 = vmatmul.f32.gmra.mxu0 %v2209_v60  ;;  %v1809_v29 = vpop.f32.mrf.mxu1 }
 0x289   : > { %v1985_v38 = vpop.f32.mrf.mxu3  ;;  %v1810_v31 = vadd.f32 %v1809_v29, %v1721_v45  ;;  %v4065_v45 = vld [vmem:[%s4223_s5] ss:$0 sm:$0xff] }
 0x28a   : > { %v1986_v58 = vadd.f32 %v1985_v38, %v1897_v11  ;;  %v4059_v61 = vpop.f32.mrf.mxu0 }
 0x28c   : > { %v2178_v3 = vadd.f32 %v2114_v14, %v1986_v58  ;;  %v2118_v14 = vld [vmem:[%s3465_s10 + $0x80] sm:$0xff] }
 0x28e   : > { %v2210_v46 = vmax.f32 %v2178_v3, 0.0  ;;  %v1898_v6 = vpop.f32.mrf.mxu2 }
 0x28f   : > { %v1899_v56 = vadd.f32 %v1898_v6, %v1810_v31 }
 0x290   : > { %2302 = vmatmul.f32.gmra.mxu0 %v2210_v46  ;;  %v1812_v22 = vpop.f32.mrf.mxu1 }
 0x291   : > { %v1987_v53 = vpop.f32.mrf.mxu3  ;;  %v1813_v48 = vadd.f32 %v1812_v22, %v1724_v54  ;;  %v2119_v22 = vld [vmem:[%s3465_s10 + $0x88] sm:$0xff] }
 0x292   : > { %v1988_v49 = vadd.f32 %v1987_v53, %v1899_v56 }
 0x293   : > { %1851 = vmatmul.bf16.gmra.mxu1 %v3857_v43  ;;  %1940 = vmatmul.bf16.gmra.mxu2 %v3859_v19 }
 0x294   : > { %v2179_v32 = vadd.f32 %v2115_v25, %v1988_v49 }
 0x296   : > { %2029 = vmatmul.bf16.gmra.mxu3 %v3861_v23  ;;  %v2211_v18 = vmax.f32 %v2179_v32, 0.0  ;;  %v1901_v50 = vpop.f32.mrf.mxu2 }
 0x297   : > { %v1902_v47 = vadd.f32 %v1901_v50, %v1813_v48 }
 0x298   : > { %2305 = vmatmul.f32.gmra.mxu0 %v2211_v18  ;;  %v1814_v27 = vpop.f32.mrf.mxu1 }
 0x299   : > { %v1990_v15 = vpop.f32.mrf.mxu3  ;;  %v1815_v19 = vadd.f32 %v1814_v27, %v1726_v62  ;;  %v2120_v27 = vld [vmem:[%s3465_s10 + $0x90] sm:$0xff] }
 0x29a   : > { %v1991_v28 = vadd.f32 %v1990_v15, %v1902_v47 }
 0x29c   : > { %v2180_v43 = vadd.f32 %v2116_v30, %v1991_v28 }
 0x29e   : > { %v2212_v9 = vmax.f32 %v2180_v43, 0.0  ;;  %v1903_v39 = vpop.f32.mrf.mxu2  ;;  %v1736_v43 = vadd.f32 %v3974_v26, %v3893_v44 }
 0x29f   : > { %v1904_v23 = vadd.f32 %v1903_v39, %v1815_v19 }
 0x2a0   : > { %2308 = vmatmul.f32.gmra.mxu0 %v2212_v9  ;;  %v1817_v55 = vpop.f32.mrf.mxu1 }
 0x2a1   : > { %v1992_v1 = vpop.f32.mrf.mxu3  ;;  %v1818_v11 = vadd.f32 %v1817_v55, %v1729_v17  ;;  %v2121_v55 = vld [vmem:[%s3465_s10 + $0x98] sm:$0xff] }
 0x2a2   : > { %v1993_v5 = vadd.f32 %v1992_v1, %v1904_v23 }
 0x2a4   : > { %v2181_v60 = vadd.f32 %v2117_v24, %v1993_v5 }
 0x2a6   : > { %v2213_v51 = vmax.f32 %v2181_v60, 0.0  ;;  %v1906_v42 = vpop.f32.mrf.mxu2  ;;  %v1739_v60 = vadd.f32 %v3982_v0, %v3901_v2 }
 0x2a7   : > { %v1907_v34 = vadd.f32 %v1906_v42, %v1818_v11 }
 0x2a8   : > { %2311 = vmatmul.f32.gmra.mxu0 %v2213_v51  ;;  %v1819_v29 = vpop.f32.mrf.mxu1 }
 0x2a9   : > { %v1995_v38 = vpop.f32.mrf.mxu3  ;;  %v1820_v31 = vadd.f32 %v1819_v29, %v1731_v7  ;;  %v2122_v29 = vld [vmem:[%s3465_s10 + $0xa0] sm:$0xff] }
 0x2aa   : > { %v1996_v58 = vadd.f32 %v1995_v38, %v1907_v34 }
 0x2ac   : > { %v2182_v12 = vadd.f32 %v2118_v14, %v1996_v58 }
 0x2ad   : > { %v2267_v3 = vpop.f32.mrf.mxu0 }
 0x2ae   : > { %v2214_v46 = vmax.f32 %v2182_v12, 0.0  ;;  %v2268_v6 = vadd.f32 %v4065_v45, %v2267_v3  ;;  %v1908_v56 = vpop.f32.mrf.mxu2  ;;  %v1741_v12 = vadd.f32 %v3986_v20, %v3904_v40 }
 0x2af   : > { %v1909_v53 = vadd.f32 %v1908_v56, %v1820_v31 }
 0x2b0   : > { %2363 = vst [vmem:[%s4071_s7] sm:$0xff] %v2268_v6  ;;  %2314 = vmatmul.f32.gmra.mxu0 %v2214_v46  ;;  %v1822_v49 = vpop.f32.mrf.mxu1 }
 0x2b1   : > { %v1997_v25 = vpop.f32.mrf.mxu3  ;;  %v1823_v48 = vadd.f32 %v1822_v49, %v1734_v16 }
 0x2b2   : > { %v1998_v54 = vadd.f32 %v1997_v25, %v1909_v53  ;;  %v2123_v25 = vld [vmem:[%s3465_s10 + $0xa8] sm:$0xff] }
 0x2b4   : > { %v2183_v37 = vadd.f32 %v2119_v22, %v1998_v54  ;;  %v1744_v54 = vadd.f32 %v3994_v41, %v3912_v8 }
 0x2b5   : > { %v2270_v32 = vpop.f32.mrf.mxu0 }
 0x2b6   : > { %v2215_v18 = vmax.f32 %v2183_v37, 0.0  ;;  %v2271_v50 = vadd.f32 %v4065_v45, %v2270_v32  ;;  %v1911_v47 = vpop.f32.mrf.mxu2 }
 0x2b7   : > { %v1912_v15 = vadd.f32 %v1911_v47, %v1823_v48  ;;  %v2124_v47 = vld [vmem:[%s3465_s10 + $0xb0] sm:$0xff] }
 0x2b8   : > { %2364 = vst [vmem:[%s4071_s7 + $0x8] sm:$0xff] %v2271_v50  ;;  %2317 = vmatmul.f32.gmra.mxu0 %v2215_v18  ;;  %v1824_v28 = vpop.f32.mrf.mxu1 }
 0x2b9   : > { %v2000_v30 = vpop.f32.mrf.mxu3  ;;  %v1825_v19 = vadd.f32 %v1824_v28, %v1736_v43 }
 0x2ba   : > { %v2001_v62 = vadd.f32 %v2000_v30, %v1912_v15 }
 0x2bc   : > { %v2184_v21 = vadd.f32 %v2120_v27, %v2001_v62  ;;  %v1746_v27 = vadd.f32 %v4000_v10, %v3917_v52 }
 0x2bd   : > { %v2273_v59 = vpop.f32.mrf.mxu0 }
 0x2be   : > { %v2216_v9 = vmax.f32 %v2184_v21, 0.0  ;;  %v2274_v39 = vadd.f32 %v4065_v45, %v2273_v59  ;;  %v1913_v23 = vpop.f32.mrf.mxu2 }
 0x2bf   : > { %v1914_v1 = vadd.f32 %v1913_v23, %v1825_v19  ;;  %v2125_v19 = vld [vmem:[%s3465_s10 + $0xb8] sm:$0xff] }
 0x2c0   : > { %2365 = vst [vmem:[%s4071_s7 + $0x10] sm:$0xff] %v2274_v39  ;;  %2320 = vmatmul.f32.gmra.mxu0 %v2216_v9  ;;  %v1827_v5 = vpop.f32.mrf.mxu1 }
 0x2c1   : > { %v2002_v24 = vpop.f32.mrf.mxu3  ;;  %v1828_v11 = vadd.f32 %v1827_v5, %v1739_v60 }
 0x2c2   : > { %v2003_v17 = vadd.f32 %v2002_v24, %v1914_v1  ;;  %v4359_v1 = vld [vmem:[#allocation22_spill] sm:$0xff] }
 0x2c3   : > { %v1749_v24 = vadd.f32 %v4006_v36, %v4359_v1 }
 0x2c4   : > { %v2185_v44 = vadd.f32 %v2121_v55, %v2003_v17 }
 0x2c5   : > { %v2276_v26 = vpop.f32.mrf.mxu0 }
 0x2c6   : > { %v2217_v51 = vmax.f32 %v2185_v44, 0.0  ;;  %v2277_v42 = vadd.f32 %v4065_v45, %v2276_v26  ;;  %v1916_v34 = vpop.f32.mrf.mxu2 }
 0x2c7   : > { %v1917_v38 = vadd.f32 %v1916_v34, %v1828_v11  ;;  %v4360_v34 = vld [vmem:[#allocation23_spill] sm:$0xff] }
 0x2c8   : > { %2366 = vst [vmem:[%s4071_s7 + $0x18] sm:$0xff] %v2277_v42  ;;  %2323 = vmatmul.f32.gmra.mxu0 %v2217_v51  ;;  %v1829_v58 = vpop.f32.mrf.mxu1  ;;  %v2126_v51 = vld [vmem:[%s3465_s10 + $0xc0] sm:$0xff] }
 0x2c9   : > { %v2005_v14 = vpop.f32.mrf.mxu3  ;;  %v1830_v46 = vadd.f32 %v1829_v58, %v1741_v12 }
 0x2ca   : > { %v2006_v7 = vadd.f32 %v2005_v14, %v1917_v38  ;;  %v1751_v38 = vadd.f32 %v4014_v57, %v4360_v34 }
 0x2cc   : > { %v2186_v2 = vadd.f32 %v2122_v29, %v2006_v7 }
 0x2cd   : > { %v2279_v0 = vpop.f32.mrf.mxu0 }
 0x2ce   : > { %v2218_v3 = vmax.f32 %v2186_v2, 0.0  ;;  %v2280_v31 = vadd.f32 %v4065_v45, %v2279_v0  ;;  %v1918_v6 = vpop.f32.mrf.mxu2 }
 0x2cf   : > { %v1919_v56 = vadd.f32 %v1918_v6, %v1830_v46  ;;  %v4361_v6 = vld [vmem:[#allocation42_spill] sm:$0xff] }
 0x2d0   : > { %2367 = vst [vmem:[%s4071_s7 + $0x20] sm:$0xff] %v2280_v31  ;;  %2326 = vmatmul.f32.gmra.mxu0 %v2218_v3  ;;  %v1832_v22 = vpop.f32.mrf.mxu1  ;;  %v2127_v3 = vld [vmem:[%s3465_s10 + $0xc8] sm:$0xff] }
 0x2d1   : > { %v2007_v53 = vpop.f32.mrf.mxu3  ;;  %v1833_v37 = vadd.f32 %v1832_v22, %v1744_v54 }
 0x2d2   : > { %v2008_v49 = vadd.f32 %v2007_v53, %v1919_v56  ;;  %v1754_v56 = vadd.f32 %v4020_v4, %v4361_v6 }
 0x2d4   : > { %v2187_v40 = vadd.f32 %v2123_v25, %v2008_v49 }
 0x2d5   : > { %v2282_v20 = vpop.f32.mrf.mxu0 }
 0x2d6   : > { %v2219_v16 = vmax.f32 %v2187_v40, 0.0  ;;  %v2283_v32 = vadd.f32 %v4065_v45, %v2282_v20  ;;  %v1921_v18 = vpop.f32.mrf.mxu2 }
 0x2d7   : > { %v1922_v48 = vadd.f32 %v1921_v18, %v1833_v37  ;;  %v4362_v18 = vld [vmem:[#allocation44_spill] sm:$0xff] }
 0x2d8   : > { %2368 = vst [vmem:[%s4071_s7 + $0x28] sm:$0xff] %v2283_v32  ;;  %2329 = vmatmul.f32.gmra.mxu0 %v2219_v16  ;;  %v1834_v15 = vpop.f32.mrf.mxu1  ;;  %v2128_v16 = vld [vmem:[%s3465_s10 + $0xd0] sm:$0xff] }
 0x2d9   : > { %v2010_v50 = vpop.f32.mrf.mxu3  ;;  %v1835_v62 = vadd.f32 %v1834_v15, %v1746_v27 }
 0x2da   : > { %v2011_v30 = vadd.f32 %v2010_v50, %v1922_v48  ;;  %v1756_v48 = vadd.f32 %v4030_v13, %v4362_v18  ;;  %v2133_v18 = vld [vmem:[%s3465_s10 + $0xf8] sm:$0xff] }
 0x2dc   : > { %v2188_v8 = vadd.f32 %v2124_v47, %v2011_v30 }
 0x2dd   : > { %v2285_v41 = vpop.f32.mrf.mxu0 }
 0x2de   : > { %v2220_v28 = vmax.f32 %v2188_v8, 0.0  ;;  %v2286_v43 = vadd.f32 %v4065_v45, %v2285_v41  ;;  %v1923_v21 = vpop.f32.mrf.mxu2 }
 0x2df   : > { %v1924_v59 = vadd.f32 %v1923_v21, %v1835_v62  ;;  %v4363_v21 = vld [vmem:[#allocation24_spill] sm:$0xff] }
 0x2e0   : > { %2369 = vst [vmem:[%s4071_s7 + $0x30] sm:$0xff] %v2286_v43  ;;  %2332 = vmatmul.f32.gmra.mxu0 %v2220_v28  ;;  %v1837_v39 = vpop.f32.mrf.mxu1  ;;  %v2129_v28 = vld [vmem:[%s3465_s10 + $0xd8] sm:$0xff] }
 0x2e1   : > { %v2012_v9 = vpop.f32.mrf.mxu3  ;;  %v1838_v5 = vadd.f32 %v1837_v39, %v1749_v24 }
 0x2e2   : > { %v2013_v23 = vadd.f32 %v2012_v9, %v1924_v59  ;;  %v1759_v59 = vadd.f32 %v4038_v35, %v4363_v21 }
 0x2e4   : > { %v2189_v52 = vadd.f32 %v2125_v19, %v2013_v23 }
 0x2e5   : > { %v2288_v10 = vpop.f32.mrf.mxu0 }
 0x2e6   : > { %v2221_v55 = vmax.f32 %v2189_v52, 0.0  ;;  %v2289_v17 = vadd.f32 %v4065_v45, %v2288_v10  ;;  %v1926_v60 = vpop.f32.mrf.mxu2  ;;  %v2130_v10 = vld [vmem:[%s3465_s10 + $0xe0] sm:$0xff] }
 0x2e7   : > { %v1927_v44 = vadd.f32 %v1926_v60, %v1838_v5 }
 0x2e8   : > { %2370 = vst [vmem:[%s4071_s7 + $0x38] sm:$0xff] %v2289_v17  ;;  %2335 = vmatmul.f32.gmra.mxu0 %v2221_v55  ;;  %v1839_v11 = vpop.f32.mrf.mxu1  ;;  %v4364_v17 = vld [vmem:[#allocation25_spill] sm:$0xff] }
 0x2e9   : > { %v2015_v26 = vpop.f32.mrf.mxu3  ;;  %v1840_v58 = vadd.f32 %v1839_v11, %v1751_v38  ;;  %v1761_v60 = vadd.f32 %v4043_v33, %v4364_v17 }
 0x2ea   : > { %v2016_v42 = vadd.f32 %v2015_v26, %v1927_v44 }
 0x2ec   : > { %v2190_v36 = vadd.f32 %v2126_v51, %v2016_v42 }
 0x2ed   : > { %v2291_v14 = vpop.f32.mrf.mxu0 }
 0x2ee   : > { %v2222_v29 = vmax.f32 %v2190_v36, 0.0  ;;  %v2292_v7 = vadd.f32 %v4065_v45, %v2291_v14  ;;  %v1928_v12 = vpop.f32.mrf.mxu2  ;;  %v2131_v36 = vld [vmem:[%s3465_s10 + $0xe8] sm:$0xff] }
 0x2ef   : > { %v1929_v2 = vadd.f32 %v1928_v12, %v1840_v58  ;;  %v4365_v58 = vld [vmem:[#allocation26_spill] sm:$0xff] }
 0x2f0   : > { %2371 = vst [vmem:[%s4071_s7 + $0x40] sm:$0xff] %v2292_v7  ;;  %2338 = vmatmul.f32.gmra.mxu0 %v2222_v29  ;;  %v1842_v46 = vpop.f32.mrf.mxu1  ;;  %v1764_v7 = vadd.f32 %v4052_v63, %v4365_v58 }
 0x2f1   : > { %v2017_v0 = vpop.f32.mrf.mxu3  ;;  %v1843_v22 = vadd.f32 %v1842_v46, %v1754_v56  ;;  %v2132_v56 = vld [vmem:[%s3465_s10 + $0xf0] sm:$0xff] }
 0x2f2   : > { %v2018_v31 = vadd.f32 %v2017_v0, %v1929_v2 }
 0x2f4   : > { %v2191_v57 = vadd.f32 %v2127_v3, %v2018_v31 }
 0x2f5   : > { %v2294_v53 = vpop.f32.mrf.mxu0 }
 0x2f6   : > { %v2223_v25 = vmax.f32 %v2191_v57, 0.0  ;;  %v2295_v49 = vadd.f32 %v4065_v45, %v2294_v53  ;;  %v1931_v54 = vpop.f32.mrf.mxu2 }
 0x2f7   : > { %v1932_v40 = vadd.f32 %v1931_v54, %v1843_v22 }
 0x2f8   : > { %2372 = vst [vmem:[%s4071_s7 + $0x48] sm:$0xff] %v2295_v49  ;;  %2341 = vmatmul.f32.gmra.mxu0 %v2223_v25  ;;  %v1844_v37 = vpop.f32.mrf.mxu1  ;;  %v4366_v25 = vld [vmem:[#allocation27_spill] sm:$0xff] }
 0x2f9   : > { %v2020_v20 = vpop.f32.mrf.mxu3  ;;  %v1845_v15 = vadd.f32 %v1844_v37, %v1756_v48  ;;  %v1766_v22 = vadd.f32 %v4059_v61, %v4366_v25 }
 0x2fa   : > { %v2021_v32 = vadd.f32 %v2020_v20, %v1932_v40 }
 0x2fc   : > { %v2192_v4 = vadd.f32 %v2128_v16, %v2021_v32 }
 0x2fd   : > { %v2297_v50 = vpop.f32.mrf.mxu0 }
 0x2fe   : > { %v2224_v47 = vmax.f32 %v2192_v4, 0.0  ;;  %v2298_v30 = vadd.f32 %v4065_v45, %v2297_v50  ;;  %v1933_v27 = vpop.f32.mrf.mxu2 }
 0x2ff   : > { %v1934_v8 = vadd.f32 %v1933_v27, %v1845_v15 }
 0x300   : > { %2373 = vst [vmem:[%s4071_s7 + $0x50] sm:$0xff] %v2298_v30  ;;  %2344 = vmatmul.f32.gmra.mxu0 %v2224_v47  ;;  %v1847_v62 = vpop.f32.mrf.mxu1 }
 0x301   : > { %v2022_v41 = vpop.f32.mrf.mxu3  ;;  %v1848_v39 = vadd.f32 %v1847_v62, %v1759_v59 }
 0x302   : > { %v2023_v43 = vadd.f32 %v2022_v41, %v1934_v8 }
 0x304   : > { %v2193_v13 = vadd.f32 %v2129_v28, %v2023_v43 }
 0x305   : > { %v2300_v9 = vpop.f32.mrf.mxu0 }
 0x306   : > { %v2225_v19 = vmax.f32 %v2193_v13, 0.0  ;;  %v2301_v23 = vadd.f32 %v4065_v45, %v2300_v9  ;;  %v1936_v1 = vpop.f32.mrf.mxu2 }
 0x307   : > { %v1937_v24 = vadd.f32 %v1936_v1, %v1848_v39 }
 0x308   : > { %2374 = vst [vmem:[%s4071_s7 + $0x58] sm:$0xff] %v2301_v23  ;;  %2347 = vmatmul.f32.gmra.mxu0 %v2225_v19  ;;  %v1849_v55 = vpop.f32.mrf.mxu1 }
 0x309   : > { %v2025_v52 = vpop.f32.mrf.mxu3  ;;  %v1850_v51 = vadd.f32 %v1849_v55, %v1761_v60 }
 0x30a   : > { %v2026_v5 = vadd.f32 %v2025_v52, %v1937_v24 }
 0x30c   : > { %v2194_v35 = vadd.f32 %v2130_v10, %v2026_v5 }
 0x30d   : > { %v2303_v44 = vpop.f32.mrf.mxu0 }
 0x30e   : > { %v2226_v26 = vmax.f32 %v2194_v35, 0.0  ;;  %v2304_v11 = vadd.f32 %v4065_v45, %v2303_v44  ;;  %v1938_v42 = vpop.f32.mrf.mxu2 }
 0x30f   : > { %v1939_v34 = vadd.f32 %v1938_v42, %v1850_v51 }
 0x310   : > { %2375 = vst [vmem:[%s4071_s7 + $0x60] sm:$0xff] %v2304_v11  ;;  %2350 = vmatmul.f32.gmra.mxu0 %v2226_v26  ;;  %v1852_v14 = vpop.f32.mrf.mxu1 }
 0x311   : > { %v2027_v38 = vpop.f32.mrf.mxu3  ;;  %v1853_v0 = vadd.f32 %v1852_v14, %v1764_v7 }
 0x312   : > { %v2028_v29 = vadd.f32 %v2027_v38, %v1939_v34 }
 0x314   : > { %v2195_v33 = vadd.f32 %v2131_v36, %v2028_v29 }
 0x315   : > { %v2306_v12 = vpop.f32.mrf.mxu0 }
 0x316   : > { %v2227_v2 = vmax.f32 %v2195_v33, 0.0  ;;  %v2307_v3 = vadd.f32 %v4065_v45, %v2306_v12  ;;  %v1941_v46 = vpop.f32.mrf.mxu2 }
 0x317   : > { %v1942_v31 = vadd.f32 %v1941_v46, %v1853_v0 }
 0x318   : > { %2376 = vst [vmem:[%s4071_s7 + $0x68] sm:$0xff] %v2307_v3  ;;  %2353 = vmatmul.f32.gmra.mxu0 %v2227_v2  ;;  %v1854_v53 = vpop.f32.mrf.mxu1 }
 0x319   : > { %v2030_v6 = vpop.f32.mrf.mxu3  ;;  %v1855_v40 = vadd.f32 %v1854_v53, %v1766_v22 }
 0x31a   : > { %v2031_v57 = vadd.f32 %v2030_v6, %v1942_v31 }
 0x31c   : > { %v2196_v63 = vadd.f32 %v2132_v56, %v2031_v57 }
 0x31d   : > { %v2309_v49 = vpop.f32.mrf.mxu0 }
 0x31e   : > { %v2228_v54 = vmax.f32 %v2196_v63, 0.0  ;;  %v2310_v20 = vadd.f32 %v4065_v45, %v2309_v49  ;;  %v1943_v16 = vpop.f32.mrf.mxu2 }
 0x31f   : > { %v1944_v37 = vadd.f32 %v1943_v16, %v1855_v40 }
 0x320   : > { %2377 = vst [vmem:[%s4071_s7 + $0x70] sm:$0xff] %v2310_v20  ;;  %2356 = vmatmul.f32.gmra.mxu0 %v2228_v54 }
 0x321   : > { %v2032_v32 = vpop.f32.mrf.mxu3 }
 0x322   : > { %v2033_v48 = vadd.f32 %v2032_v32, %v1944_v37 }
 0x324   : > { %v2197_v4 = vadd.f32 %v2133_v18, %v2033_v48 }
 0x325   : > { %v2312_v50 = vpop.f32.mrf.mxu0 }
 0x326   : > { %v2229_v61 = vmax.f32 %v2197_v4, 0.0  ;;  %v2313_v47 = vadd.f32 %v4065_v45, %v2312_v50 }
 0x328   : > { %2378 = vst [vmem:[%s4071_s7 + $0x78] sm:$0xff] %v2313_v47  ;;  %2359 = vmatmul.f32.gmra.mxu0 %v2229_v61 }
 0x32d   : > { %v2315_v15 = vpop.f32.mrf.mxu0 }
 0x32e   : > { %v2316_v30 = vadd.f32 %v4065_v45, %v2315_v15 }
 0x330   : > { %2379 = vst [vmem:[%s4071_s7 + $0x80] sm:$0xff] %v2316_v30 }
 0x335   : > { %v2318_v27 = vpop.f32.mrf.mxu0 }
 0x336   : > { %v2319_v8 = vadd.f32 %v4065_v45, %v2318_v27 }
 0x338   : > { %2380 = vst [vmem:[%s4071_s7 + $0x88] sm:$0xff] %v2319_v8 }
 0x33d   : > { %v2321_v41 = vpop.f32.mrf.mxu0 }
 0x33e   : > { %v2322_v28 = vadd.f32 %v4065_v45, %v2321_v41 }
 0x340   : > { %2381 = vst [vmem:[%s4071_s7 + $0x90] sm:$0xff] %v2322_v28 }
 0x345   : > { %v2324_v62 = vpop.f32.mrf.mxu0 }
 0x346   : > { %v2325_v43 = vadd.f32 %v4065_v45, %v2324_v62 }
 0x348   : > { %2382 = vst [vmem:[%s4071_s7 + $0x98] sm:$0xff] %v2325_v43 }
 0x34d   : > { %v2327_v21 = vpop.f32.mrf.mxu0 }
 0x34e   : > { %v2328_v59 = vadd.f32 %v4065_v45, %v2327_v21 }
 0x350   : > { %2383 = vst [vmem:[%s4071_s7 + $0xa0] sm:$0xff] %v2328_v59 }
 0x355   : > { %v2330_v13 = vpop.f32.mrf.mxu0 }
 0x356   : > { %v2331_v9 = vadd.f32 %v4065_v45, %v2330_v13 }
 0x358   : > { %2384 = vst [vmem:[%s4071_s7 + $0xa8] sm:$0xff] %v2331_v9 }
 0x35d   : > { %v2333_v19 = vpop.f32.mrf.mxu0 }
 0x35e   : > { %v2334_v39 = vadd.f32 %v4065_v45, %v2333_v19 }
 0x360   : > { %2385 = vst [vmem:[%s4071_s7 + $0xb0] sm:$0xff] %v2334_v39 }
 0x365   : > { %v2336_v23 = vpop.f32.mrf.mxu0 }
 0x366   : > { %v2337_v1 = vadd.f32 %v4065_v45, %v2336_v23 }
 0x368   : > { %2386 = vst [vmem:[%s4071_s7 + $0xb8] sm:$0xff] %v2337_v1 }
 0x36d   : > { %v2339_v24 = vpop.f32.mrf.mxu0 }
 0x36e   : > { %v2340_v52 = vadd.f32 %v4065_v45, %v2339_v24 }
 0x370   : > { %2387 = vst [vmem:[%s4071_s7 + $0xc0] sm:$0xff] %v2340_v52 }
 0x375   : > { %v2342_v10 = vpop.f32.mrf.mxu0 }
 0x376   : > { %v2343_v55 = vadd.f32 %v4065_v45, %v2342_v10 }
 0x378   : > { %2388 = vst [vmem:[%s4071_s7 + $0xc8] sm:$0xff] %v2343_v55 }
 0x37d   : > { %v2345_v5 = vpop.f32.mrf.mxu0 }
 0x37e   : > { %v2346_v17 = vadd.f32 %v4065_v45, %v2345_v5 }
 0x380   : > { %2389 = vst [vmem:[%s4071_s7 + $0xd0] sm:$0xff] %v2346_v17 }
 0x385   : > { %v2348_v60 = vpop.f32.mrf.mxu0 }
 0x386   : > { %v2349_v35 = vadd.f32 %v4065_v45, %v2348_v60 }
 0x388   : > { %2390 = vst [vmem:[%s4071_s7 + $0xd8] sm:$0xff] %v2349_v35 }
 0x38d   : > { %v2351_v44 = vpop.f32.mrf.mxu0 }
 0x38e   : > { %v2352_v26 = vadd.f32 %v4065_v45, %v2351_v44 }
 0x390   : > { %2391 = vst [vmem:[%s4071_s7 + $0xe0] sm:$0xff] %v2352_v26 }
 0x395   : > { %v2354_v51 = vpop.f32.mrf.mxu0 }
 0x396   : > { %v2355_v11 = vadd.f32 %v4065_v45, %v2354_v51 }
 0x398   : > { %2392 = vst [vmem:[%s4071_s7 + $0xe8] sm:$0xff] %v2355_v11 }
 0x39d   : > { %v2357_v42 = vpop.f32.mrf.mxu0 }
 0x39e   : > { %v2358_v34 = vadd.f32 %v4065_v45, %v2357_v42 }
 0x3a0   : > { %2393 = vst [vmem:[%s4071_s7 + $0xf0] sm:$0xff] %v2358_v34 }
 0x3a5   : > { %v2360_v38 = vpop.f32.mrf.mxu0 }
 0x3a6   : > { %v2361_v36 = vadd.f32 %v4065_v45, %v2360_v38 }
 0x3a8   : > { %2394 = vst [vmem:[%s4071_s7 + $0xf8] sm:$0xff] %v2361_v36 }
 0x3a9   : > { %3208 = shalt.err (!%p3205_p0)
}
 0x3aa   : > { %s3286_s1 = smov 128   ;;  %s3287_s4 = smov 8  }
 0x3ab   : > { %2940 = dma.vmem_to_hbm [thread:$0]  (%p3411_p3), %s2409_s8, 4096, %s2411_s11, %s2396_s17, %s3286_s1, %s3286_s1, %s3287_s4  }
 0x3ac PF: > { %s2425_s25 = sand.u32 1, %s3255_s21   ;;  %p2960_p5 = pnand %p2556_p11, %p3368_p6 }
 0x3ad   : > { %s2426_s0 = scalar_lea.sflag [#allocation5], %s2425_s25 }
 0x3ae   : > { %p2961_p7 = pneg %p2960_p5 }
 0x3b0   : > { %3250 = dma.done.wait (%p2961_p7), %s2426_s0, 4096  }
 0x3b1   : > { %3252 = vsyncadd (%p2961_p7), %s2426_s0, 4294963200  ;;  %s26_s26 = sadd.s32 1, %s3275_s26   ;;  %s4367_s23 = sld [smem:[#allocation18_spill]] }
 0x3b2   : > { %p23_p9 = scmp.ge.s32.totalorder %s26_s26, 4   ;;  %s4368_s10 = sld [smem:[#allocation21_spill]] }
 0x3b3   : > { %s4369_s24 = sld [smem:[#allocation19_spill]]  ;;  %s4371_s21 = smov %s3259_s22 }
 0x3b4   : > { %s4370_s25 = sld [smem:[#allocation20_spill]]  ;;  %25 = sbr.rel (!%p23_p9) target bundleno = 14 (0xe), region = 124 }
 0x3b7   : > { %s4372_s22 = smov %s4367_s23 }
 0x3b8   : > { %s4373_s23 = smov %s4368_s10 }
 0x3b9   :  { %2432 = vsyncpa [#allocation4], 1 }
 0x3ba   :  { %2434 = vsyncpa [#allocation4 + $0x1], 1 }
 0x3bb   :  { %2435 = vsyncpa [#allocation7], 1 }
 0x3bc   :  { %2436 = vsyncpa [#allocation10], 1 }
 0x3bd   :  { %2438 = vsyncpa [#allocation10 + $0x1], 1 }
 0x3be   :  { %2439 = vsyncpa [#allocation5], 1 }
 0x3bf   :  { %2441 = vsyncpa [#allocation5 + $0x1], 1 }

</bundles_post_ra>
